<compile_context>
chip_gen: v7x
topology: tpu7x:2x2x1
jax: 0.10.0
libtpu: 0.0.40
codegen_flags: <defaults>
</compile_context>

<pallas_src>
import jax
import jax.numpy as jnp
from jax import lax
from jax.experimental import pallas as pl
from jax.experimental.pallas import tpu as pltpu

LN_EPS = 1e-5          # PyTorch nn.LayerNorm default
K_IN = 7 * 6           # 42
D1, D2, D3, D_OUT = 256, 128, 64, 3


def _round_up(x, m):
    return ((x + m - 1) // m) * m


def _ln_normalize(h):
    """LayerNorm WITHOUT affine (gamma/beta are folded into the next Linear).

    var = E[h^2] - mean^2: one fewer full-tile VPU pass than the two-pass
    form and the two cross-lane reductions are independent.  Clamped at 0 so
    f32 cancellation can never push var below -eps and NaN the rsqrt.
    """
    mean = jnp.mean(h, axis=-1, keepdims=True)
    mean_sq = jnp.mean(h * h, axis=-1, keepdims=True)
    var = jnp.maximum(mean_sq - mean * mean, 0.0)
    return (h - mean) * lax.rsqrt(var + LN_EPS)


def mlp_self_kernel(x_ref, w1_ref, b1_ref, w2_ref, b2_ref, w3_ref, b3_ref,
                    w4t_ref, b4t_ref, o_ref):
    # x arrives f32 straight from HBM (no wrapper pad/cast pass); cast here.
    x = x_ref[...].astype(jnp.bfloat16)                          # (TB, 42)

    # Linear(42->256) -> ReLU -> LayerNorm (affine folded into w2/b2)
    h1 = jnp.dot(x, w1_ref[...], preferred_element_type=jnp.float32) + b1_ref[...]
    h1 = _ln_normalize(jnp.maximum(h1, 0.0))                     # (TB, 256) f32

    # Linear(256->128) -> ReLU -> LayerNorm (affine folded into w3/b3)
    h2 = jnp.dot(h1.astype(jnp.bfloat16), w2_ref[...],
                 preferred_element_type=jnp.float32) + b2_ref[...]
    h2 = _ln_normalize(jnp.maximum(h2, 0.0))                     # (TB, 128) f32

    # Linear(128->64) -> ReLU
    h3 = jnp.dot(h2.astype(jnp.bfloat16), w3_ref[...],
                 preferred_element_type=jnp.float32) + b3_ref[...]
    h3 = jnp.maximum(h3, 0.0).astype(jnp.bfloat16)               # (TB, 64)

    # Linear(64->3), emitted TRANSPOSED so the output block is lane-dense:
    #   out_t[c, t] = sum_k w4t[c, k] * h3[t, k]
    # (q @ k^T-style dot_general; stays on the MXU, avoids masked (TB,3)
    #  stores and lane-padded output VMEM).
    out_t = lax.dot_general(
        w4t_ref[...], h3,
        dimension_numbers=(((1,), (1,)), ((), ())),
        preferred_element_type=jnp.float32,
    ) + b4t_ref[...]                                             # (3, TB) f32
    o_ref[...] = out_t


def _choose_tb(batch, tb_max, min_steps=4):
    """Batch-tile size.

    * multiple of 128 whenever grid > 1 (needed for the lane-dense transposed
      output block), multiple of 8 for the single-step case;
    * aims for >= min_steps grid steps so ("parallel",) actually occupies both
      TensorCores on v7x;
    * capped at tb_max to respect the per-generation VMEM budget.
    """
    tb = _round_up(pl.cdiv(batch, min_steps), 128)
    tb = min(tb, _round_up(tb_max, 128))
    if tb >= batch:                       # tiny batch: single step, minimal padding
        tb = _round_up(batch, 8)
    return max(tb, 8)


def mlp_self_forward(x, params, *, tb_max=2048):
    # x.view(-1, 7*6), exactly like the PyTorch module
    x2d = x.reshape(-1, K_IN).astype(jnp.float32)
    B = x2d.shape[0]

    TB = _choose_tb(B, tb_max)
    num_blocks = pl.cdiv(B, TB)
    Bp = num_blocks * TB            # output padded to whole blocks (tiny; sliced off)
    grid = (num_blocks,)

    operands = [
        x2d,
        params["w1"], params["b1"],
        params["w2"], params["b2"],
        params["w3"], params["b3"],
        params["w4t"], params["b4t"],
    ]

    def resident(arr):              # constant index_map -> stays in VMEM across steps
        return pl.BlockSpec(arr.shape, lambda i: (0, 0))

    # Ragged last input block: reads are clipped to B rows, pad rows are
    # garbage but rows are independent and those columns are never kept.
    in_specs = [pl.BlockSpec((TB, K_IN), lambda i: (i, 0))]
    in_specs += [resident(a) for a in operands[1:]]
    out_specs = pl.BlockSpec((D_OUT, TB), lambda i: (0, i))      # lane-dense output

    flops_per_row = 2 * (K_IN * D1 + D1 * D2 + D2 * D3 + D3 * D_OUT)
    param_bytes = sum(int(a.size) * a.dtype.itemsize for a in operands[1:])
    cost = pl.CostEstimate(
        flops=int(Bp) * flops_per_row,
        transcendentals=2 * int(Bp),                 # one rsqrt per LayerNorm per row
        bytes_accessed=int(x2d.size) * 4 + D_OUT * int(Bp) * 4 + param_bytes,
    )

    out_t = pl.pallas_call(
        mlp_self_kernel,
        out_shape=jax.ShapeDtypeStruct((D_OUT, Bp), jnp.float32),
        grid=grid,
        in_specs=in_specs,
        out_specs=out_specs,
        compiler_params=pltpu.CompilerParams(
            dimension_semantics=("parallel",),       # batch axis -> both TCs on v7x
            vmem_limit_bytes=32 * 1024 * 1024,       # covers TB=2048 on v5e's 16 MiB default
        ),
        cost_estimate=cost,
    )(*operands)

    out = out_t[:, :B].T                             # (B, 3); tiny wrapper-side op
    return jnp.squeeze(out)                          # torch .squeeze()


# --------------------------------------------------------------------------
# Parameter construction / preparation
# --------------------------------------------------------------------------
def init_raw_params(key):
    """f32 parameters, PyTorch-style init (Linear: U(+-1/sqrt(fan_in)));
    LayerNorm affine made non-trivial so the fold path is actually exercised."""
    dims = [(K_IN, D1), (D1, D2), (D2, D3), (D3, D_OUT)]
    keys = jax.random.split(key, 2 * len(dims) + 4)
    p = {}
    for i, (fi, fo) in enumerate(dims):
        bound = 1.0 / (fi ** 0.5)
        p[f"w{i+1}"] = jax.random.uniform(keys[2 * i], (fi, fo), minval=-bound,
                                          maxval=bound, dtype=jnp.float32)
        p[f"b{i+1}"] = jax.random.uniform(keys[2 * i + 1], (fo,), minval=-bound,
                                          maxval=bound, dtype=jnp.float32)
    p["g1"] = jax.random.uniform(keys[-4], (D1,), minval=0.5, maxval=1.5, dtype=jnp.float32)
    p["be1"] = jax.random.uniform(keys[-3], (D1,), minval=-0.2, maxval=0.2, dtype=jnp.float32)
    p["g2"] = jax.random.uniform(keys[-2], (D2,), minval=0.5, maxval=1.5, dtype=jnp.float32)
    p["be2"] = jax.random.uniform(keys[-1], (D2,), minval=-0.2, maxval=0.2, dtype=jnp.float32)
    return p


def prepare_params(raw):
    """One-time kernel parameter prep (outside the hot path):
      * fold LN affines into the following Linear (exact: ReLU precedes LN):
          W2' = diag(g1)@W2, b2' = be1@W2 + b2 ; W3' = diag(g2)@W3, b3' = be2@W3 + b3
      * store matmul weights in bf16 (MXU operands), biases in f32
      * pre-transpose the head: w4t = W4^T (3,64), b4t = b4 (3,1) for the
        lane-dense transposed output block.
    """
    w2f = raw["w2"] * raw["g1"][:, None]
    b2f = raw["be1"] @ raw["w2"] + raw["b2"]
    w3f = raw["w3"] * raw["g2"][:, None]
    b3f = raw["be2"] @ raw["w3"] + raw["b3"]
    return {
        "w1": raw["w1"].astype(jnp.bfloat16),
        "b1": raw["b1"].reshape(1, D1).astype(jnp.float32),
        "w2": w2f.astype(jnp.bfloat16),
        "b2": b2f.reshape(1, D2).astype(jnp.float32),
        "w3": w3f.astype(jnp.bfloat16),
        "b3": b3f.reshape(1, D3).astype(jnp.float32),
        "w4t": raw["w4"].T.astype(jnp.bfloat16),      # (3, 64)
        "b4t": raw["b4"].reshape(D_OUT, 1).astype(jnp.float32),
    }


# --------------------------------------------------------------------------
# References
# --------------------------------------------------------------------------
def reference_forward_f32(x, raw):
    """Pure-f32 reference with exact PyTorch MLP_self semantics (unfolded LN)."""
    def ln(h, g, b):
        mean = jnp.mean(h, axis=-1, keepdims=True)
        var = jnp.mean((h - mean) ** 2, axis=-1, keepdims=True)
        return (h - mean) / jnp.sqrt(var + LN_EPS) * g + b
    h = x.reshape(-1, K_IN).astype(jnp.float32)
    h = ln(jnp.maximum(h @ raw["w1"] + raw["b1"], 0.0), raw["g1"], raw["be1"])
    h = ln(jnp.maximum(h @ raw["w2"] + raw["b2"], 0.0), raw["g2"], raw["be2"])
    h = jnp.maximum(h @ raw["w3"] + raw["b3"], 0.0)
    h = h @ raw["w4"] + raw["b4"]
    return jnp.squeeze(h)


def reference_forward_kernel_numerics(x, params):
    """Plain-JAX reference mirroring the kernel's exact numerics
    (folded bf16 weights, f32 accumulation, no-affine LN, transposed head)."""
    h = x.reshape(-1, K_IN).astype(jnp.float32).astype(jnp.bfloat16)
    h = jnp.dot(h, params["w1"], preferred_element_type=jnp.float32) + params["b1"]
    h = _ln_normalize(jnp.maximum(h, 0.0))
    h = jnp.dot(h.astype(jnp.bfloat16), params["w2"],
                preferred_element_type=jnp.float32) + params["b2"]
    h = _ln_normalize(jnp.maximum(h, 0.0))
    h = jnp.dot(h.astype(jnp.bfloat16), params["w3"],
                preferred_element_type=jnp.float32) + params["b3"]
    h = jnp.maximum(h, 0.0).astype(jnp.bfloat16)
    out_t = lax.dot_general(params["w4t"], h, (((1,), (1,)), ((), ())),
                            preferred_element_type=jnp.float32) + params["b4t"]
    return jnp.squeeze(out_t.T)


if __name__ == "__main__":
    key = jax.random.PRNGKey(0)
    k_param, k_x = jax.random.split(key)

    raw = init_raw_params(k_param)
    params = prepare_params(raw)

    # 300 samples of 7x6 features: x.view(-1, 42) -> (300, 42).
    # With tb_max=128 this runs a 3-step grid whose last input block is ragged
    # (300 = 2*128 + 44), exercising the clipped-read path and the lane-dense
    # transposed output.
    x = jax.random.normal(k_x, (300, 7, 6), dtype=jnp.float32)

    out = jax.block_until_ready(mlp_self_forward(x, params, tb_max=128))
    assert out.shape == (300, D_OUT), out.shape

    ref_mech = reference_forward_kernel_numerics(x, params)   # same numerics
    ref_f32 = reference_forward_f32(x, raw)                   # PyTorch semantics
    assert jnp.allclose(out, ref_mech, atol=2e-3, rtol=2e-3), "mismatch vs bf16 reference"
    assert jnp.allclose(out, ref_f32, atol=5e-2, rtol=5e-2), "mismatch vs f32 reference"

    print("KERNEL_OK")
</pallas_src>

<mosaic_0001>
module attributes {stable_mosaic.version = 11 : i64} {
  func.func @mlp_self_kernel(%arg0: i32, %arg1: memref<128x42xf32, #tpu.memory_space<vmem>>, %arg2: memref<42x256xbf16, #tpu.memory_space<vmem>>, %arg3: memref<1x256xf32, #tpu.memory_space<vmem>>, %arg4: memref<256x128xbf16, #tpu.memory_space<vmem>>, %arg5: memref<1x128xf32, #tpu.memory_space<vmem>>, %arg6: memref<128x64xbf16, #tpu.memory_space<vmem>>, %arg7: memref<1x64xf32, #tpu.memory_space<vmem>>, %arg8: memref<3x64xbf16, #tpu.memory_space<vmem>>, %arg9: memref<3x1xf32, #tpu.memory_space<vmem>>, %arg10: memref<3x128xf32, #tpu.memory_space<vmem>>) attributes {dimension_semantics = [#tpu.dimension_semantics<parallel>], iteration_bounds = array<i64: 3>, scalar_prefetch = 0 : i64, scratch_operands = 0 : i64, tpu.core_type = #tpu.core_type<tc>, window_params = [{transform_indices = @transform_0, window_bounds = array<i64: 128, 42>}, {pipeline_mode = #tpu.pipeline_mode<synchronous>, transform_indices = @transform_1, window_bounds = array<i64: 42, 256>}, {pipeline_mode = #tpu.pipeline_mode<synchronous>, transform_indices = @transform_2, window_bounds = array<i64: 1, 256>}, {pipeline_mode = #tpu.pipeline_mode<synchronous>, transform_indices = @transform_3, window_bounds = array<i64: 256, 128>}, {pipeline_mode = #tpu.pipeline_mode<synchronous>, transform_indices = @transform_4, window_bounds = array<i64: 1, 128>}, {pipeline_mode = #tpu.pipeline_mode<synchronous>, transform_indices = @transform_5, window_bounds = array<i64: 128, 64>}, {pipeline_mode = #tpu.pipeline_mode<synchronous>, transform_indices = @transform_6, window_bounds = array<i64: 1, 64>}, {pipeline_mode = #tpu.pipeline_mode<synchronous>, transform_indices = @transform_7, window_bounds = array<i64: 3, 64>}, {pipeline_mode = #tpu.pipeline_mode<synchronous>, transform_indices = @transform_8, window_bounds = array<i64: 3, 1>}, {transform_indices = @transform_9, window_bounds = array<i64: 3, 128>}]} {
    %c0 = arith.constant 0 : index
    %c0_0 = arith.constant 0 : index
    %0 = vector.load %arg1[%c0, %c0_0] : memref<128x42xf32, #tpu.memory_space<vmem>>, vector<128x42xf32>
    %1 = arith.truncf %0 : vector<128x42xf32> to vector<128x42xbf16>
    %c0_1 = arith.constant 0 : index
    %c0_2 = arith.constant 0 : index
    %2 = vector.load %arg2[%c0_1, %c0_2] : memref<42x256xbf16, #tpu.memory_space<vmem>>, vector<42x256xbf16>
    %cst = arith.constant dense<0.000000e+00> : vector<128x256xf32>
    %3 = tpu.matmul %1, %2, %cst {dimension_numbers = #tpu.dot_dimension_numbers<[1], [0], [0], [1], [0, 0, 1, 1], [], []>} : vector<128x42xbf16>, vector<42x256xbf16>, vector<128x256xf32> -> vector<128x256xf32>
    %c0_3 = arith.constant 0 : index
    %c0_4 = arith.constant 0 : index
    %4 = vector.load %arg3[%c0_3, %c0_4] : memref<1x256xf32, #tpu.memory_space<vmem>>, vector<1x256xf32>
    %5 = vector.broadcast %4 : vector<1x256xf32> to vector<128x256xf32>
    %6 = arith.addf %3, %5 : vector<128x256xf32>
    %cst_5 = arith.constant 0.000000e+00 : f32
    %7 = vector.broadcast %cst_5 : f32 to vector<128x256xf32>
    %8 = arith.maximumf %6, %7 : vector<128x256xf32>
    %cst_6 = arith.constant dense<0.000000e+00> : vector<128xf32>
    %9 = vector.multi_reduction <add>, %8, %cst_6 [1] : vector<128x256xf32> to vector<128xf32>
    %10 = vector.shape_cast %9 : vector<128xf32> to vector<128x1xf32>
    %cst_7 = arith.constant 2.560000e+02 : f32
    %11 = vector.broadcast %cst_7 : f32 to vector<128x1xf32>
    %12 = arith.divf %10, %11 : vector<128x1xf32>
    %13 = arith.mulf %8, %8 : vector<128x256xf32>
    %cst_8 = arith.constant dense<0.000000e+00> : vector<128xf32>
    %14 = vector.multi_reduction <add>, %13, %cst_8 [1] : vector<128x256xf32> to vector<128xf32>
    %15 = vector.shape_cast %14 : vector<128xf32> to vector<128x1xf32>
    %cst_9 = arith.constant 2.560000e+02 : f32
    %16 = vector.broadcast %cst_9 : f32 to vector<128x1xf32>
    %17 = arith.divf %15, %16 : vector<128x1xf32>
    %18 = arith.mulf %12, %12 : vector<128x1xf32>
    %19 = arith.subf %17, %18 : vector<128x1xf32>
    %cst_10 = arith.constant 0.000000e+00 : f32
    %20 = vector.broadcast %cst_10 : f32 to vector<128x1xf32>
    %21 = arith.maximumf %19, %20 : vector<128x1xf32>
    %22 = vector.broadcast %12 : vector<128x1xf32> to vector<128x256xf32>
    %23 = arith.subf %8, %22 : vector<128x256xf32>
    %cst_11 = arith.constant 9.99999974E-6 : f32
    %24 = vector.broadcast %cst_11 : f32 to vector<128x1xf32>
    %25 = arith.addf %21, %24 : vector<128x1xf32>
    %26 = math.rsqrt %25 : vector<128x1xf32>
    %27 = vector.broadcast %26 : vector<128x1xf32> to vector<128x256xf32>
    %28 = arith.mulf %23, %27 : vector<128x256xf32>
    %29 = arith.truncf %28 : vector<128x256xf32> to vector<128x256xbf16>
    %c0_12 = arith.constant 0 : index
    %c0_13 = arith.constant 0 : index
    %30 = vector.load %arg4[%c0_12, %c0_13] : memref<256x128xbf16, #tpu.memory_space<vmem>>, vector<256x128xbf16>
    %cst_14 = arith.constant dense<0.000000e+00> : vector<128x128xf32>
    %31 = tpu.matmul %29, %30, %cst_14 {dimension_numbers = #tpu.dot_dimension_numbers<[1], [0], [0], [1], [0, 0, 1, 1], [], []>} : vector<128x256xbf16>, vector<256x128xbf16>, vector<128x128xf32> -> vector<128x128xf32>
    %c0_15 = arith.constant 0 : index
    %c0_16 = arith.constant 0 : index
    %32 = vector.load %arg5[%c0_15, %c0_16] : memref<1x128xf32, #tpu.memory_space<vmem>>, vector<1x128xf32>
    %33 = vector.broadcast %32 : vector<1x128xf32> to vector<128x128xf32>
    %34 = arith.addf %31, %33 : vector<128x128xf32>
    %cst_17 = arith.constant 0.000000e+00 : f32
    %35 = vector.broadcast %cst_17 : f32 to vector<128x128xf32>
    %36 = arith.maximumf %34, %35 : vector<128x128xf32>
    %cst_18 = arith.constant dense<0.000000e+00> : vector<128xf32>
    %37 = vector.multi_reduction <add>, %36, %cst_18 [1] : vector<128x128xf32> to vector<128xf32>
    %38 = vector.shape_cast %37 : vector<128xf32> to vector<128x1xf32>
    %cst_19 = arith.constant 1.280000e+02 : f32
    %39 = vector.broadcast %cst_19 : f32 to vector<128x1xf32>
    %40 = arith.divf %38, %39 : vector<128x1xf32>
    %41 = arith.mulf %36, %36 : vector<128x128xf32>
    %cst_20 = arith.constant dense<0.000000e+00> : vector<128xf32>
    %42 = vector.multi_reduction <add>, %41, %cst_20 [1] : vector<128x128xf32> to vector<128xf32>
    %43 = vector.shape_cast %42 : vector<128xf32> to vector<128x1xf32>
    %cst_21 = arith.constant 1.280000e+02 : f32
    %44 = vector.broadcast %cst_21 : f32 to vector<128x1xf32>
    %45 = arith.divf %43, %44 : vector<128x1xf32>
    %46 = arith.mulf %40, %40 : vector<128x1xf32>
    %47 = arith.subf %45, %46 : vector<128x1xf32>
    %cst_22 = arith.constant 0.000000e+00 : f32
    %48 = vector.broadcast %cst_22 : f32 to vector<128x1xf32>
    %49 = arith.maximumf %47, %48 : vector<128x1xf32>
    %50 = vector.broadcast %40 : vector<128x1xf32> to vector<128x128xf32>
    %51 = arith.subf %36, %50 : vector<128x128xf32>
    %cst_23 = arith.constant 9.99999974E-6 : f32
    %52 = vector.broadcast %cst_23 : f32 to vector<128x1xf32>
    %53 = arith.addf %49, %52 : vector<128x1xf32>
    %54 = math.rsqrt %53 : vector<128x1xf32>
    %55 = vector.broadcast %54 : vector<128x1xf32> to vector<128x128xf32>
    %56 = arith.mulf %51, %55 : vector<128x128xf32>
    %57 = arith.truncf %56 : vector<128x128xf32> to vector<128x128xbf16>
    %c0_24 = arith.constant 0 : index
    %c0_25 = arith.constant 0 : index
    %58 = vector.load %arg6[%c0_24, %c0_25] : memref<128x64xbf16, #tpu.memory_space<vmem>>, vector<128x64xbf16>
    %cst_26 = arith.constant dense<0.000000e+00> : vector<128x64xf32>
    %59 = tpu.matmul %57, %58, %cst_26 {dimension_numbers = #tpu.dot_dimension_numbers<[1], [0], [0], [1], [0, 0, 1, 1], [], []>} : vector<128x128xbf16>, vector<128x64xbf16>, vector<128x64xf32> -> vector<128x64xf32>
    %c0_27 = arith.constant 0 : index
    %c0_28 = arith.constant 0 : index
    %60 = vector.load %arg7[%c0_27, %c0_28] : memref<1x64xf32, #tpu.memory_space<vmem>>, vector<1x64xf32>
    %61 = vector.broadcast %60 : vector<1x64xf32> to vector<128x64xf32>
    %62 = arith.addf %59, %61 : vector<128x64xf32>
    %cst_29 = arith.constant 0.000000e+00 : f32
    %63 = vector.broadcast %cst_29 : f32 to vector<128x64xf32>
    %64 = arith.maximumf %62, %63 : vector<128x64xf32>
    %65 = arith.truncf %64 : vector<128x64xf32> to vector<128x64xbf16>
    %c0_30 = arith.constant 0 : index
    %c0_31 = arith.constant 0 : index
    %66 = vector.load %arg8[%c0_30, %c0_31] : memref<3x64xbf16, #tpu.memory_space<vmem>>, vector<3x64xbf16>
    %cst_32 = arith.constant dense<0.000000e+00> : vector<3x128xf32>
    %67 = tpu.matmul %66, %65, %cst_32 {dimension_numbers = #tpu.dot_dimension_numbers<[1], [1], [0], [0], [0, 0, 1, 0], [], []>} : vector<3x64xbf16>, vector<128x64xbf16>, vector<3x128xf32> -> vector<3x128xf32>
    %c0_33 = arith.constant 0 : index
    %c0_34 = arith.constant 0 : index
    %68 = vector.load %arg9[%c0_33, %c0_34] : memref<3x1xf32, #tpu.memory_space<vmem>>, vector<3x1xf32>
    %69 = vector.broadcast %68 : vector<3x1xf32> to vector<3x128xf32>
    %70 = arith.addf %67, %69 : vector<3x128xf32>
    %c0_35 = arith.constant 0 : index
    %c0_36 = arith.constant 0 : index
    %71 = vector.load %arg10[%c0_35, %c0_36] : memref<3x128xf32, #tpu.memory_space<vmem>>, vector<3x128xf32>
    tpu.vector_store %arg10[%c0_35, %c0_36], %70 {strides = array<i32>} : memref<3x128xf32, #tpu.memory_space<vmem>>, vector<3x128xf32>,
    return
  }
  func.func @transform_0(%arg0: i32) -> (i32, i32) {
    %c0_i32 = arith.constant 0 : i32
    %c0_i32_0 = arith.constant 0 : i32
    return %arg0, %c0_i32 : i32, i32
  }
  func.func @transform_1(%arg0: i32) -> (i32, i32) {
    %c0_i32 = arith.constant 0 : i32
    %c0_i32_0 = arith.constant 0 : i32
    %c0_i32_1 = arith.constant 0 : i32
    return %c0_i32, %c0_i32_0 : i32, i32
  }
  func.func @transform_2(%arg0: i32) -> (i32, i32) {
    %c0_i32 = arith.constant 0 : i32
    %c0_i32_0 = arith.constant 0 : i32
    %c0_i32_1 = arith.constant 0 : i32
    return %c0_i32, %c0_i32_0 : i32, i32
  }
  func.func @transform_3(%arg0: i32) -> (i32, i32) {
    %c0_i32 = arith.constant 0 : i32
    %c0_i32_0 = arith.constant 0 : i32
    %c0_i32_1 = arith.constant 0 : i32
    return %c0_i32, %c0_i32_0 : i32, i32
  }
  func.func @transform_4(%arg0: i32) -> (i32, i32) {
    %c0_i32 = arith.constant 0 : i32
    %c0_i32_0 = arith.constant 0 : i32
    %c0_i32_1 = arith.constant 0 : i32
    return %c0_i32, %c0_i32_0 : i32, i32
  }
  func.func @transform_5(%arg0: i32) -> (i32, i32) {
    %c0_i32 = arith.constant 0 : i32
    %c0_i32_0 = arith.constant 0 : i32
    %c0_i32_1 = arith.constant 0 : i32
    return %c0_i32, %c0_i32_0 : i32, i32
  }
  func.func @transform_6(%arg0: i32) -> (i32, i32) {
    %c0_i32 = arith.constant 0 : i32
    %c0_i32_0 = arith.constant 0 : i32
    %c0_i32_1 = arith.constant 0 : i32
    return %c0_i32, %c0_i32_0 : i32, i32
  }
  func.func @transform_7(%arg0: i32) -> (i32, i32) {
    %c0_i32 = arith.constant 0 : i32
    %c0_i32_0 = arith.constant 0 : i32
    %c0_i32_1 = arith.constant 0 : i32
    return %c0_i32, %c0_i32_0 : i32, i32
  }
  func.func @transform_8(%arg0: i32) -> (i32, i32) {
    %c0_i32 = arith.constant 0 : i32
    %c0_i32_0 = arith.constant 0 : i32
    %c0_i32_1 = arith.constant 0 : i32
    return %c0_i32, %c0_i32_0 : i32, i32
  }
  func.func @transform_9(%arg0: i32) -> (i32, i32) {
    %c0_i32 = arith.constant 0 : i32
    %c0_i32_0 = arith.constant 0 : i32
    return %c0_i32, %arg0 : i32, i32
  }
}

</mosaic_0001>

<bundles_post_ra>
// kernel: tpu_custom_call.1
= control target key start
LH: loop header
LB: loop body
LE: loop exit
PB: predicated region body
PF: predicated region fallthrough
CT: control target
= control target key end

     0   :  { %14 = vsyncpa [#allocation3], 0  ;;  %s2937_s0 = inlined_call_operand.vmem [shape: f32[300,42], index: 0, kind: input, shape index: {}]   ;;  %s2938_s1 = inlined_call_operand.vmem [shape: bf16[42,256], index: 1, kind: input, shape index: {}]   ;;  %s2939_s2 = inlined_call_operand.vmem [shape: f32[1,256], index: 2, kind: input, shape index: {}]   ;;  %s2940_s3 = inlined_call_operand.vmem [shape: bf16[256,128], index: 3, kind: input, shape index: {}]   ;;  %s2941_s4 = inlined_call_operand.vmem [shape: f32[1,128], index: 4, kind: input, shape index: {}]   ;;  %s2942_s5 = inlined_call_operand.vmem [shape: bf16[128,64], index: 5, kind: input, shape index: {}]   ;;  %s2943_s6 = inlined_call_operand.vmem [shape: f32[1,64], index: 6, kind: input, shape index: {}]   ;;  %s2944_s7 = inlined_call_operand.vmem [shape: bf16[3,64], index: 7, kind: input, shape index: {}]   ;;  %s2945_s8 = inlined_call_operand.vmem [shape: f32[3,1], index: 8, kind: input, shape index: {}]   ;;  %s2946_s9 = inlined_call_operand.hbm [shape: f32[3,384], index: 9, kind: output, shape index: {}]  }
   0x1   :  { %16 = vsyncpa [#allocation3 + $0x1], 0  ;;  %s2196_s30 = smov 0   ;;  %s2198_s10 = smov 0  }
   0x2   :  { %s2200_s11 = smov 0   ;;  %s2202_s12 = smov 0  }
   0x3 LB: > { %s2217_s13 = sadd.s32 4294967295, %s2140_s12   ;;  %s1744_s14 = sadd.s32 4294967294, %s2140_s12   ;;  %s2140_s12 = sphi %s2202_s12, %s2952_s12   ;;  %s2136_s11 = sphi %s2200_s11, %s2951_s11   ;;  %s2132_s10 = sphi %s2198_s10, %s2950_s10   ;;  %s2128_s30 = sphi %s2196_s30, %s2949_s30  }
   0x4   : > { %s2221_s15 = sadd.s32 1, %s2140_s12   ;;  %s223_s16 = sadd.s32 1, %s2136_s11 }
   0x5   : > { %s220_s17 = ssub.s32 %s2140_s12, %s2221_s15  ;;  %p233_p0 = scmp.ne.s32.totalorder %s2136_s11, %s2132_s10 }
   0x6   : > { %p221_p1 = scmp.eq.s32.totalorder %s220_s17, 0  ;;  %p234_p2 = scmp.eq.s32.totalorder %s2217_s13, 2 }
   0x7   : > { %p239_p3 = scmp.ne.s32.totalorder %s2132_s10, %s2128_s30  ;;  %p240_p4 = scmp.eq.s32.totalorder %s1744_s14, 2 }
   0x8   : > { %s2232_s18 = scalar_select %p221_p1, %s2136_s11, %s223_s16  }
   0x9   : > { %p2234_p5 = por %p234_p2, %p233_p0  ;;  %p2238_p6 = por %p240_p4, %p239_p3 }
   0xa   : > { %p1747_p7 = scmp.ge.s32.totalorder %s2140_s12, 1  ;;  %p299_p8 = scmp.lt.s32.totalorder %s2140_s12, 4 }
   0xc   : > { %p300_p9 = pnand %p1747_p7, %p299_p8 }
   0xd   : > { %v1981_v0 = vld [vmem:[%s2938_s1 + $0x4] ss:$8 sps:$4 sm:$0xff] (!%p300_p9)   ;;  %v1983_v1 = vld [vmem:[%s2938_s1] ss:$8 sps:$4 sm:$0xff] (!%p300_p9)   ;;  %v2142_v2 = vmov (!%p300_p9), 0   ;;  %s1749_s25 = sshll.u32 (!%p300_p9), %s2217_s13, 4  ;;  %v386_v34 = vlaneseq (!%p300_p9) }
   0xe   : > { %303 = sbr.rel (%p300_p9) target bundleno = 1329 (0x531), region = 56  ;;  %488 = vmatprep.mubr.bf16.mxu0 (!%p300_p9), %v2142_v2  ;;  %1980 = vset.pattern.permute.xlu0 (!%p300_p9), %v2142_v2  ;;  %v1984_v3 = vld [vmem:[%s2938_s1 + $0x14] ss:$8 sps:$4 sm:$0xff] (!%p300_p9)   ;;  %v1986_v4 = vld [vmem:[%s2938_s1 + $0x10] ss:$8 sps:$4 sm:$0xff] (!%p300_p9)   ;;  %p344_p10 = scmp.lt.s32.totalorder (!%p300_p9), %s1749_s25, 37 }
   0xf   : > { %456 = vmatprep.subr.bf16.mxu0 (!%p300_p9), %v1981_v0  ;;  %v1987_v5 = vld [vmem:[%s2938_s1 + $0x24] ss:$8 sps:$4 sm:$0x1f] (!%p300_p9)   ;;  %v1989_v6 = vld [vmem:[%s2938_s1 + $0x20] ss:$8 sps:$4 sm:$0x1f] (!%p300_p9)  }
  0x10   : > { %457 = vmatpush1.bf16.msra.mxu0 (!%p300_p9), %v1983_v1  ;;  %vm449_vm0 = vcmask (!%p300_p9), 1044480   ;;  %vm424_vm1 = vcmask (!%p300_p9), 343040   ;;  %v1990_v32 = vld [vmem:[%s2940_s3 + $0x40] sm:$0xff] (!%p300_p9)   ;;  %v387_v35 = vshrl.u32 (!%p300_p9), %v386_v34, 7  ;;  %vm2144_vm2 = vmmov (!%p300_p9), 0   ;;  %s336_s24 = sand.u32 (!%p300_p9), 1, %s2132_s10  }
  0x11   : > { %458 = vmatprep.subr.bf16.mxu0 (!%p300_p9), %v1984_v3  ;;  %v451_v7 = vsel (!%p300_p9), %vm449_vm0, %v1989_v6, 0  ;;  %v1991_v33 = vld [vmem:[%s2940_s3] sm:$0xff] (!%p300_p9)   ;;  %1797 = vmatprep.subr.bf16.mxu1 (!%p300_p9), %v1990_v32  ;;  %v1992_v32 = vld [vmem:[%s2940_s3 + $0x48] sm:$0xff] (!%p300_p9)   ;;  %vm1602_vm3 = vcmask (!%p300_p9), 523264   ;;  %s1672_s17 = scalar_lea.sflag (!%p300_p9), [#allocation3], %s336_s24  ;;  %s2145_s21 = smov (!%p300_p9), [#allocation2]  }
  0x12   : > { %1798 = vmatpush3.bf16.msra.mxu1 (!%p300_p9), %v1991_v33  ;;  %v388_v36 = vsub.s32 (!%p300_p9), 0, %v387_v35  ;;  %v384_v37 = vld [vmem:[%s2939_s2] sm:$0x3] (!%p300_p9)  ;;  %v392_v38 = vsub.s32 (!%p300_p9), 1, %v387_v35  ;;  %v1993_v33 = vld [vmem:[%s2940_s3 + $0x8] sm:$0xff] (!%p300_p9)  }
  0x13   : > { %1799 = vmatprep.subr.bf16.mxu1 (!%p300_p9), %v1992_v32 }
  0x14   : > { %459 = vmatpush1.bf16.msra.mxu0 (!%p300_p9), %v1986_v4  ;;  %v2301_v39 = vrot.slane (!%p300_p9), %v384_v37, %v388_v36  ;;  %v2303_v40 = vrot.slane (!%p300_p9), %v384_v37, %v392_v38 }
  0x15   : > { %s2954_s25 = smov (!%p344_p10, %s1749_s25), 37  ;;  %1757 = vmatprep.subr.msk.bf16.mxu0 %vm449_vm0, %v1987_v5 }
  0x16   : > { %s1750_s22 = sshll.u32 %s2954_s25, 3  ;;  %1800 = vmatpush3.bf16.msra.mxu1 %v1993_v33  ;;  %s1794_s25 = sshll.u32 %s2217_s13, 6 }
  0x17   : > { %s2266_s26 = scalar_lea.vmem %s2937_s0, %s1750_s22  ;;  %s2895_s16 = scalar_lea.hbm %s2946_s9, %s1794_s25 }
  0x18   : > { %v354_v8 = vld [vmem:[%s2266_s26] sm:$0xff]  ;;  %v355_v9 = vld [vmem:[%s2266_s26 + $0x8] sm:$0xff]  ;;  %461 = vmatpush1.bf16.msra.mxu0 %v451_v7  ;;  %v356_v11 = vld [vmem:[%s2266_s26 + $0x10] sm:$0xff]  ;;  %s2082_s22 = sshll.u32 %s2145_s21, 4  ;;  %s2083_s22 = int_to_ptr.vmem [resolvable:$false] %s2082_s22 }
  0x19   : > { %v370_v10 = vpack.c.bf16 %v355_v9, %v354_v8  ;;  %v357_v12 = vld [vmem:[%s2266_s26 + $0x18] sm:$0xff]  ;;  %v358_v14 = vld [vmem:[%s2266_s26 + $0x20] sm:$0xff]  ;;  %v359_v15 = vld [vmem:[%s2266_s26 + $0x28] sm:$0xff]  ;;  %s2084_s23 = scalar_lea.vmem %s2083_s22, 128 }
  0x1a   : > { %v371_v13 = vpack.c.bf16 %v357_v12, %v356_v11  ;;  %v372_v16 = vpack.c.bf16 %v359_v15, %v358_v14  ;;  %v360_v17 = vld [vmem:[%s2266_s26 + $0x30] sm:$0xff]  ;;  %v361_v18 = vld [vmem:[%s2266_s26 + $0x38] sm:$0xff]  ;;  %v362_v20 = vld [vmem:[%s2266_s26 + $0x40] sm:$0xff] }
  0x1b   : > { %1758 = vmatmul.mubr.msk.bf16.vlgmr.msra.gmra.mrb[0].mxu0 %vm424_vm1, %v370_v10  ;;  %v373_v19 = vpack.c.bf16 %v361_v18, %v360_v17  ;;  %v363_v21 = vld [vmem:[%s2266_s26 + $0x48] sm:$0xff]  ;;  %v364_v23 = vld [vmem:[%s2266_s26 + $0x50] sm:$0xff]  ;;  %v365_v24 = vld [vmem:[%s2266_s26 + $0x58] sm:$0xff] }
  0x1c   : > { %498 = vmatprep.mubr.bf16.mxu0 %v2142_v2  ;;  %v374_v22 = vpack.c.bf16 %v363_v21, %v362_v20  ;;  %v375_v25 = vpack.c.bf16 %v365_v24, %v364_v23  ;;  %v366_v26 = vld [vmem:[%s2266_s26 + $0x60] sm:$0xff]  ;;  %v367_v27 = vld [vmem:[%s2266_s26 + $0x68] sm:$0xff]  ;;  %v368_v29 = vld [vmem:[%s2266_s26 + $0x70] sm:$0xff] }
  0x1d   : > { %v376_v28 = vpack.c.bf16 %v367_v27, %v366_v26  ;;  %v369_v30 = vld [vmem:[%s2266_s26 + $0x78] sm:$0xff]  ;;  %s1748_s26 = sshll.u32 %s336_s24, 2 }
  0x1e   : > { %v377_v31 = vpack.c.bf16 %v369_v30, %v368_v29  ;;  %s338_s27 = scalar_lea.vmem [#allocation2], %s1748_s26 }
  0x1f   : > { %s1685_s28 = sshll.u32 %s338_s27, 4  ;;  %s2897_s28 = int_to_ptr.vmem [resolvable:$true] %s1685_s28 }
  0x20   : > { %s2078_s13 = scalar_lea.vmem %s2897_s28, 64  ;;  %p2085_p0 = scmp.lt.s32.totalorder %s2897_s28, %s2083_s22 }
  0x21   : > { %p2079_p11 = scmp.ne.s32.totalorder %s2897_s28, %s2078_s13  ;;  %p2086_p1 = scmp.lt.s32.totalorder %s2084_s23, %s2078_s13 }
  0x23   : > { %1759 = vmatmul.mubr.msk.bf16.gmra.mrb[4].mxu0 %vm424_vm1, %v371_v13  ;;  %p2080_p12 = pnand %p2079_p11, %p2234_p5  ;;  %p2087_p2 = por %p2086_p1, %p2085_p0 }
  0x24   : > { %508 = vmatprep.mubr.bf16.mxu0 %v2142_v2 }
  0x25   : > { %p2081_p13 = pneg %p2080_p12 }
  0x27   : > { %p2088_p3 = pnand %p2087_p2, %p2081_p13 }
  0x2b   : > { %1760 = vmatmul.mubr.msk.bf16.gmra.mrb[8].mxu0 %vm424_vm1, %v372_v16 }
  0x2c   : > { %518 = vmatprep.mubr.bf16.mxu0 %v2142_v2 }
  0x33   : > { %1761 = vmatmul.mubr.msk.bf16.gmra.mrb[12].mxu0 %vm424_vm1, %v373_v19 }
  0x34   : > { %528 = vmatprep.mubr.bf16.mxu0 %v2142_v2 }
  0x3b   : > { %1762 = vmatmul.mubr.msk.bf16.gmra.mrb[16].mxu0 %vm424_vm1, %v374_v22 }
  0x3c   : > { %538 = vmatprep.mubr.bf16.mxu0 %v2142_v2 }
  0x43   : > { %1763 = vmatmul.mubr.msk.bf16.gmra.mrb[20].mxu0 %vm424_vm1, %v375_v25 }
  0x44   : > { %548 = vmatprep.mubr.bf16.mxu0 %v2142_v2 }
  0x4b   : > { %1764 = vmatmul.mubr.msk.bf16.gmra.mrb[24].mxu0 %vm424_vm1, %v376_v28 }
  0x4c   : > { %558 = vmatprep.mubr.bf16.mxu0 %v2142_v2 }
  0x53   : > { %1765 = vmatmul.mubr.msk.bf16.gmra.mrb[28].mxu0 %vm424_vm1, %v377_v31 }
  0xee   : > { %v490_v41 = vpop.f32.mrb[0].mxu0 }
  0xef   : > { %v491_v42 = vadd.f32 %v490_v41, %v2301_v39  ;;  %v492_v43 = vpop.f32.mrb[1].mxu0 }
  0xf0   : > { %v493_v44 = vadd.f32 %v492_v43, %v2303_v40  ;;  %v494_v45 = vpop.f32.mrb[2].mxu0 }
  0xf1   : > { %v2307_v46 = vmax.f32 %v491_v42, 0.0  ;;  %v495_v47 = vadd.f32 %v494_v45, %v2301_v39  ;;  %v496_v48 = vpop.f32.mrb[3].mxu0  ;;  %v1994_v45 = vld [vmem:[%s2940_s3 + $0x50] sm:$0xff]  }
  0xf2   : > { %v2310_v49 = vmax.f32 %v493_v44, 0.0  ;;  %v497_v50 = vadd.f32 %v496_v48, %v2303_v40  ;;  %1801 = vmatprep.subr.bf16.mxu1 %v1994_v45 }
  0xf3   : > { %v2313_v51 = vmax.f32 %v495_v47, 0.0  ;;  %v666_v52 = vmul.f32 %v2307_v46, %v2307_v46 }
  0xf4   : > { %v2317_v53 = vmax.f32 %v497_v50, 0.0  ;;  %v601_v54 = vadd.f32 %v2310_v49, %v2307_v46  ;;  %v667_v55 = vmul.f32 %v2310_v49, %v2310_v49 }
  0xf5   : > { %v668_v58 = vmul.f32 %v2313_v51, %v2313_v51 }
  0xf6   : > { %v500_v56 = vpop.f32.mrb[4].mxu0  ;;  %602 = vadd.xlane.f32.xlu0 %v601_v54  ;;  %v698_v57 = vadd.f32 %v667_v55, %v666_v52  ;;  %v669_v59 = vmul.f32 %v2317_v53, %v2317_v53  ;;  %v604_v0 = vadd.f32 %v2317_v53, %v2313_v51  ;;  %v1995_v52 = vld [vmem:[%s2940_s3 + $0x10] sm:$0xff]  }
  0xf7   : > { %v501_v60 = vadd.f32 %v500_v56, %v2301_v39  ;;  %v502_v61 = vpop.f32.mrb[5].mxu0  ;;  %1802 = vmatpush3.bf16.msra.mxu1 %v1995_v52 }
  0xf8   : > { %v503_v62 = vadd.f32 %v502_v61, %v2303_v40  ;;  %v504_v63 = vpop.f32.mrb[6].mxu0  ;;  %699 = vadd.xlane.f32.xlu1 %v698_v57  ;;  %v701_v6 = vadd.f32 %v669_v59, %v668_v58 }
  0xf9   : > { %v2331_v1 = vmax.f32 %v501_v60, 0.0  ;;  %v505_v2 = vadd.f32 %v504_v63, %v2301_v39  ;;  %v506_v3 = vpop.f32.mrb[7].mxu0 }
  0xfa   : > { %v2334_v4 = vmax.f32 %v503_v62, 0.0  ;;  %v507_v5 = vadd.f32 %v506_v3, %v2303_v40  ;;  %605 = vadd.xlane.f32.xlu0 %v604_v0  ;;  %v1996_v62 = vld [vmem:[%s2940_s3 + $0x58] sm:$0xff]  }
  0xfb   : > { %v2337_v7 = vmax.f32 %v505_v2, 0.0  ;;  %v670_v10 = vmul.f32 %v2331_v1, %v2331_v1  ;;  %1803 = vmatprep.subr.bf16.mxu1 %v1996_v62 }
  0xfc   : > { %v2339_v8 = vmax.f32 %v507_v5, 0.0  ;;  %702 = vadd.xlane.f32.xlu1 %v701_v6  ;;  %v607_v9 = vadd.f32 %v2334_v4, %v2331_v1  ;;  %v671_v11 = vmul.f32 %v2334_v4, %v2334_v4  ;;  %v1997_v5 = vld [vmem:[%s2940_s3 + $0x18] sm:$0xff]  }
  0xfd   : > { %v672_v14 = vmul.f32 %v2337_v7, %v2337_v7  ;;  %1804 = vmatpush3.bf16.msra.mxu1 %v1997_v5 }
  0xfe   : > { %v510_v12 = vpop.f32.mrb[8].mxu0  ;;  %608 = vadd.xlane.f32.xlu0 %v607_v9  ;;  %v610_v13 = vadd.f32 %v2339_v8, %v2337_v7  ;;  %v673_v15 = vmul.f32 %v2339_v8, %v2339_v8  ;;  %v704_v20 = vadd.f32 %v671_v11, %v670_v10 }
  0xff   : > { %v511_v16 = vadd.f32 %v510_v12, %v2301_v39  ;;  %v512_v17 = vpop.f32.mrb[9].mxu0 }
 0x100   : > { %v513_v18 = vadd.f32 %v512_v17, %v2303_v40  ;;  %v514_v19 = vpop.f32.mrb[10].mxu0  ;;  %611 = vadd.xlane.f32.xlu1 %v610_v13  ;;  %v707_v26 = vadd.f32 %v673_v15, %v672_v14 }
 0x101   : > { %v2355_v21 = vmax.f32 %v511_v16, 0.0  ;;  %v515_v22 = vadd.f32 %v514_v19, %v2301_v39  ;;  %v516_v23 = vpop.f32.mrb[11].mxu0  ;;  %v1998_v16 = vld [vmem:[%s2940_s3 + $0x60] sm:$0xff]  }
 0x102   : > { %v2358_v24 = vmax.f32 %v513_v18, 0.0  ;;  %v517_v25 = vadd.f32 %v516_v23, %v2303_v40  ;;  %705 = vadd.xlane.f32.xlu0 %v704_v20  ;;  %v1999_v20 = vld [vmem:[%s2940_s3 + $0x20] sm:$0xff]   ;;  %1805 = vmatprep.subr.bf16.mxu1 %v1998_v16 }
 0x103   : > { %v2361_v27 = vmax.f32 %v515_v22, 0.0  ;;  %v674_v30 = vmul.f32 %v2355_v21, %v2355_v21  ;;  %1806 = vmatpush3.bf16.msra.mxu1 %v1999_v20 }
 0x104   : > { %v2363_v28 = vmax.f32 %v517_v25, 0.0  ;;  %708 = vadd.xlane.f32.xlu1 %v707_v26  ;;  %v613_v29 = vadd.f32 %v2358_v24, %v2355_v21  ;;  %v675_v31 = vmul.f32 %v2358_v24, %v2358_v24 }
 0x105   : > { %v676_v36 = vmul.f32 %v2361_v27, %v2361_v27 }
 0x106   : > { %v520_v34 = vpop.f32.mrb[12].mxu0  ;;  %614 = vadd.xlane.f32.xlu0 %v613_v29  ;;  %v616_v35 = vadd.f32 %v2363_v28, %v2361_v27  ;;  %v677_v37 = vmul.f32 %v2363_v28, %v2363_v28  ;;  %v710_v44 = vadd.f32 %v675_v31, %v674_v30  ;;  %v2000_v30 = vld [vmem:[%s2940_s3 + $0x68] sm:$0xff]  }
 0x107   : > { %v521_v38 = vadd.f32 %v520_v34, %v2301_v39  ;;  %v522_v41 = vpop.f32.mrb[13].mxu0  ;;  %1807 = vmatprep.subr.bf16.mxu1 %v2000_v30 }
 0x108   : > { %v523_v42 = vadd.f32 %v522_v41, %v2303_v40  ;;  %v524_v43 = vpop.f32.mrb[14].mxu0  ;;  %617 = vadd.xlane.f32.xlu1 %v616_v35  ;;  %v713_v56 = vadd.f32 %v677_v37, %v676_v36  ;;  %v2001_v35 = vld [vmem:[%s2940_s3 + $0x28] sm:$0xff]  }
 0x109   : > { %v2388_v47 = vmax.f32 %v521_v38, 0.0  ;;  %v525_v48 = vadd.f32 %v524_v43, %v2301_v39  ;;  %v526_v50 = vpop.f32.mrb[15].mxu0  ;;  %1808 = vmatpush3.bf16.msra.mxu1 %v2001_v35 }
 0x10a   : > { %v2394_v54 = vmax.f32 %v523_v42, 0.0  ;;  %v527_v55 = vadd.f32 %v526_v50, %v2303_v40  ;;  %711 = vadd.xlane.f32.xlu0 %v710_v44 }
 0x10b   : > { %v2397_v57 = vmax.f32 %v525_v48, 0.0  ;;  %v678_v60 = vmul.f32 %v2388_v47, %v2388_v47  ;;  %v2002_v48 = vld [vmem:[%s2940_s3 + $0x70] sm:$0xff]  }
 0x10c   : > { %v2399_v58 = vmax.f32 %v527_v55, 0.0  ;;  %714 = vadd.xlane.f32.xlu1 %v713_v56  ;;  %v619_v59 = vadd.f32 %v2394_v54, %v2388_v47  ;;  %v679_v61 = vmul.f32 %v2394_v54, %v2394_v54  ;;  %v2003_v56 = vld [vmem:[%s2940_s3 + $0x30] sm:$0xff]   ;;  %1809 = vmatprep.subr.bf16.mxu1 %v2002_v48 }
 0x10d   : > { %v680_v2 = vmul.f32 %v2397_v57, %v2397_v57  ;;  %1810 = vmatpush3.bf16.msra.mxu1 %v2003_v56 }
 0x10e   : > { %v530_v63 = vpop.f32.mrb[16].mxu0  ;;  %620 = vadd.xlane.f32.xlu0 %v619_v59  ;;  %v622_v0 = vadd.f32 %v2399_v58, %v2397_v57  ;;  %v681_v3 = vmul.f32 %v2399_v58, %v2399_v58  ;;  %v716_v12 = vadd.f32 %v679_v61, %v678_v60 }
 0x10f   : > { %v531_v6 = vadd.f32 %v530_v63, %v2301_v39  ;;  %v532_v9 = vpop.f32.mrb[17].mxu0 }
 0x110   : > { %v533_v10 = vadd.f32 %v532_v9, %v2303_v40  ;;  %v534_v11 = vpop.f32.mrb[18].mxu0  ;;  %623 = vadd.xlane.f32.xlu1 %v622_v0  ;;  %v719_v19 = vadd.f32 %v681_v3, %v680_v2  ;;  %v2004_v0 = vld [vmem:[%s2940_s3 + $0x78] sm:$0xff]  }
 0x111   : > { %v2421_v13 = vmax.f32 %v531_v6, 0.0  ;;  %v535_v14 = vadd.f32 %v534_v11, %v2301_v39  ;;  %v536_v15 = vpop.f32.mrb[19].mxu0  ;;  %v2005_v9 = vld [vmem:[%s2940_s3 + $0x38] sm:$0xff]   ;;  %1811 = vmatprep.subr.bf16.mxu1 %v2004_v0 }
 0x112   : > { %v2427_v17 = vmax.f32 %v533_v10, 0.0  ;;  %v537_v18 = vadd.f32 %v536_v15, %v2303_v40  ;;  %717 = vadd.xlane.f32.xlu0 %v716_v12  ;;  %1812 = vmatpush3.bf16.msra.mxu1 %v2005_v9 }
 0x113   : > { %v2433_v22 = vmax.f32 %v535_v14, 0.0  ;;  %v682_v26 = vmul.f32 %v2421_v13, %v2421_v13 }
 0x114   : > { %v2435_v23 = vmax.f32 %v537_v18, 0.0  ;;  %720 = vadd.xlane.f32.xlu1 %v719_v19  ;;  %v625_v25 = vadd.f32 %v2427_v17, %v2421_v13  ;;  %v683_v29 = vmul.f32 %v2427_v17, %v2427_v17 }
 0x115   : > { %v684_v33 = vmul.f32 %v2433_v22, %v2433_v22 }
 0x116   : > { %v540_v31 = vpop.f32.mrb[20].mxu0  ;;  %626 = vadd.xlane.f32.xlu0 %v625_v25  ;;  %v628_v32 = vadd.f32 %v2435_v23, %v2433_v22  ;;  %v685_v34 = vmul.f32 %v2435_v23, %v2435_v23  ;;  %v722_v42 = vadd.f32 %v683_v29, %v682_v26 }
 0x117   : > { %v541_v36 = vadd.f32 %v540_v31, %v2301_v39  ;;  %v542_v37 = vpop.f32.mrb[21].mxu0 }
 0x118   : > { %v543_v38 = vadd.f32 %v542_v37, %v2303_v40  ;;  %v544_v41 = vpop.f32.mrb[22].mxu0  ;;  %629 = vadd.xlane.f32.xlu1 %v628_v32  ;;  %v725_v55 = vadd.f32 %v685_v34, %v684_v33 }
 0x119   : > { %v2457_v43 = vmax.f32 %v541_v36, 0.0  ;;  %v545_v44 = vadd.f32 %v544_v41, %v2301_v39  ;;  %v546_v45 = vpop.f32.mrb[23].mxu0 }
 0x11a   : > { %v2463_v50 = vmax.f32 %v543_v38, 0.0  ;;  %v547_v52 = vadd.f32 %v546_v45, %v2303_v40  ;;  %723 = vadd.xlane.f32.xlu0 %v722_v42 }
 0x11b   : > { %v2469_v59 = vmax.f32 %v545_v44, 0.0  ;;  %v686_v62 = vmul.f32 %v2457_v43, %v2457_v43 }
 0x11c   : > { %v2471_v60 = vmax.f32 %v547_v52, 0.0  ;;  %726 = vadd.xlane.f32.xlu1 %v725_v55  ;;  %v631_v61 = vadd.f32 %v2463_v50, %v2457_v43  ;;  %v687_v63 = vmul.f32 %v2463_v50, %v2463_v50 }
 0x11d   : > { %v688_v5 = vmul.f32 %v2469_v59, %v2469_v59 }
 0x11e   : > { %v550_v2 = vpop.f32.mrb[24].mxu0  ;;  %632 = vadd.xlane.f32.xlu0 %v631_v61  ;;  %v634_v3 = vadd.f32 %v2471_v60, %v2469_v59  ;;  %v689_v6 = vmul.f32 %v2471_v60, %v2471_v60  ;;  %v728_v15 = vadd.f32 %v687_v63, %v686_v62 }
 0x11f   : > { %v551_v10 = vadd.f32 %v550_v2, %v2301_v39  ;;  %v552_v11 = vpop.f32.mrb[25].mxu0 }
 0x120   : > { %v553_v12 = vadd.f32 %v552_v11, %v2303_v40  ;;  %v554_v14 = vpop.f32.mrb[26].mxu0  ;;  %635 = vadd.xlane.f32.xlu1 %v634_v3  ;;  %v731_v26 = vadd.f32 %v689_v6, %v688_v5 }
 0x121   : > { %v2493_v16 = vmax.f32 %v551_v10, 0.0  ;;  %v555_v18 = vadd.f32 %v554_v14, %v2301_v39  ;;  %v556_v19 = vpop.f32.mrb[27].mxu0 }
 0x122   : > { %v2496_v20 = vmax.f32 %v553_v12, 0.0  ;;  %v557_v25 = vadd.f32 %v556_v19, %v2303_v40  ;;  %729 = vadd.xlane.f32.xlu0 %v728_v15 }
 0x123   : > { %v2499_v29 = vmax.f32 %v555_v18, 0.0  ;;  %v690_v32 = vmul.f32 %v2493_v16, %v2493_v16 }
 0x124   : > { %v2501_v30 = vmax.f32 %v557_v25, 0.0  ;;  %732 = vadd.xlane.f32.xlu1 %v731_v26  ;;  %v637_v31 = vadd.f32 %v2496_v20, %v2493_v16  ;;  %v691_v33 = vmul.f32 %v2496_v20, %v2496_v20 }
 0x125   : > { %v692_v36 = vmul.f32 %v2499_v29, %v2499_v29 }
 0x126   : > { %v560_v34 = vpop.f32.mrb[28].mxu0  ;;  %638 = vadd.xlane.f32.xlu0 %v637_v31  ;;  %v640_v35 = vadd.f32 %v2501_v30, %v2499_v29  ;;  %v693_v37 = vmul.f32 %v2501_v30, %v2501_v30  ;;  %v734_v45 = vadd.f32 %v691_v33, %v690_v32 }
 0x127   : > { %v561_v38 = vadd.f32 %v560_v34, %v2301_v39  ;;  %v562_v41 = vpop.f32.mrb[29].mxu0 }
 0x128   : > { %v563_v42 = vadd.f32 %v562_v41, %v2303_v40  ;;  %v564_v44 = vpop.f32.mrb[30].mxu0  ;;  %641 = vadd.xlane.f32.xlu1 %v640_v35  ;;  %v737_v62 = vadd.f32 %v693_v37, %v692_v36 }
 0x129   : > { %v2517_v48 = vmax.f32 %v561_v38, 0.0  ;;  %v565_v52 = vadd.f32 %v564_v44, %v2301_v39  ;;  %v566_v55 = vpop.f32.mrb[31].mxu0 }
 0x12a   : > { %v2520_v56 = vmax.f32 %v563_v42, 0.0  ;;  %v567_v61 = vadd.f32 %v566_v55, %v2303_v40  ;;  %735 = vadd.xlane.f32.xlu0 %v734_v45 }
 0x12b   : > { %v2523_v63 = vmax.f32 %v565_v52, 0.0  ;;  %v694_v3 = vmul.f32 %v2517_v48, %v2517_v48 }
 0x12c   : > { %v2525_v0 = vmax.f32 %v567_v61, 0.0  ;;  %738 = vadd.xlane.f32.xlu1 %v737_v62  ;;  %v643_v2 = vadd.f32 %v2520_v56, %v2517_v48  ;;  %v695_v39 = vmul.f32 %v2520_v56, %v2520_v56 }
 0x12d   : > { %v696_v5 = vmul.f32 %v2523_v63, %v2523_v63 }
 0x12e   : > { %644 = vadd.xlane.f32.xlu0 %v643_v2  ;;  %v646_v40 = vadd.f32 %v2525_v0, %v2523_v63  ;;  %v697_v6 = vmul.f32 %v2525_v0, %v2525_v0  ;;  %v740_v9 = vadd.f32 %v695_v39, %v694_v3 }
 0x130   : > { %647 = vadd.xlane.f32.xlu1 %v646_v40  ;;  %v743_v10 = vadd.f32 %v697_v6, %v696_v5 }
 0x132   : > { %741 = vadd.xlane.f32.xlu0 %v740_v9 }
 0x134   : > { %744 = vadd.xlane.f32.xlu1 %v743_v10 }
 0x183   : > { %v603_v11 = vpop.xlane.xlu0 %602 }
 0x184   : > { %v650_v12 = vmul.f32 0.00390625, %v603_v11 }
 0x185   : > { %v700_v14 = vpop.xlane.xlu1 %699 }
 0x186   : > { %v746_v15 = vmul.f32 0.00390625, %v700_v14  ;;  %v762_v18 = vmul.f32 %v650_v12, %v650_v12 }
 0x187   : > { %v606_v19 = vpop.xlane.xlu0 %605 }
 0x188   : > { %v778_v25 = vsub.f32 %v746_v15, %v762_v18  ;;  %v651_v26 = vmul.f32 0.00390625, %v606_v19 }
 0x189   : > { %v703_v31 = vpop.xlane.xlu1 %702 }
 0x18a   : > { %v794_v32 = vmax.f32 %v778_v25, 0.0  ;;  %v747_v33 = vmul.f32 0.00390625, %v703_v31  ;;  %v763_v34 = vmul.f32 %v651_v26, %v651_v26 }
 0x18b   : > { %v609_v35 = vpop.xlane.xlu0 %608 }
 0x18c   : > { %v842_v36 = vadd.f32 1e-05, %v794_v32  ;;  %v779_v37 = vsub.f32 %v747_v33, %v763_v34  ;;  %v2539_v38 = vmul.f32 0.00390625, %v609_v35 }
 0x18d   : > { %v612_v41 = vpop.xlane.xlu1 %611 }
 0x18e   : > { %v795_v42 = vmax.f32 %v779_v37, 0.0  ;;  %v2541_v44 = vmul.f32 0.00390625, %v612_v41  ;;  %2014 = vrsqrt.f32 %v842_v36  ;;  %v764_v55 = vmul.f32 %v2539_v38, %v2539_v38 }
 0x18f   : > { %v706_v45 = vpop.xlane.xlu0 %705  ;;  %v810_v37 = vsub.f32 %v2307_v46, %v650_v12  ;;  %v812_v41 = vsub.f32 %v2313_v51, %v651_v26 }
 0x190   : > { %v843_v52 = vadd.f32 1e-05, %v795_v42  ;;  %v748_v61 = vmul.f32 0.00390625, %v706_v45  ;;  %v765_v3 = vmul.f32 %v2541_v44, %v2541_v44  ;;  %v811_v45 = vsub.f32 %v2310_v49, %v650_v12 }
 0x191   : > { %v709_v62 = vpop.xlane.xlu1 %708 }
 0x192   : > { %2016 = vrsqrt.f32 %v843_v52  ;;  %v780_v2 = vsub.f32 %v748_v61, %v764_v55  ;;  %v749_v39 = vmul.f32 0.00390625, %v709_v62  ;;  %v813_v52 = vsub.f32 %v2317_v53, %v651_v26 }
 0x193   : > { %v615_v40 = vpop.xlane.xlu0 %614 }
 0x194   : > { %v796_v5 = vmax.f32 %v780_v2, 0.0  ;;  %v781_v6 = vsub.f32 %v749_v39, %v765_v3  ;;  %v2547_v9 = vmul.f32 0.00390625, %v615_v40 }
 0x195   : > { %v618_v10 = vpop.xlane.xlu1 %617 }
 0x196   : > { %v844_v11 = vadd.f32 1e-05, %v796_v5  ;;  %v797_v14 = vmax.f32 %v781_v6, 0.0  ;;  %v2549_v15 = vmul.f32 0.00390625, %v618_v10  ;;  %v766_v25 = vmul.f32 %v2547_v9, %v2547_v9 }
 0x197   : > { %v712_v18 = vpop.xlane.xlu0 %711 }
 0x198   : > { %2018 = vrsqrt.f32 %v844_v11  ;;  %v845_v19 = vadd.f32 1e-05, %v797_v14  ;;  %v750_v31 = vmul.f32 0.00390625, %v712_v18  ;;  %v2015_v33 = vpop.eup %2014  ;;  %v767_v35 = vmul.f32 %v2549_v15, %v2549_v15 }
 0x199   : > { %v715_v32 = vpop.xlane.xlu1 %714  ;;  %v875_v39 = vmul.f32 %v2015_v33, %v811_v45  ;;  %v874_v5 = vmul.f32 %v2015_v33, %v810_v37  ;;  %v814_v33 = vsub.f32 %v2331_v1, %v2539_v38 }
 0x19a   : > { %2020 = vrsqrt.f32 %v845_v19  ;;  %v782_v34 = vsub.f32 %v750_v31, %v766_v25  ;;  %v751_v36 = vmul.f32 0.00390625, %v715_v32 }
 0x19b   : > { %v621_v42 = vpop.xlane.xlu0 %620 }
 0x19c   : > { %v2017_v55 = vpop.eup %2016  ;;  %v798_v61 = vmax.f32 %v782_v34, 0.0  ;;  %v783_v62 = vsub.f32 %v751_v36, %v767_v35  ;;  %v2559_v2 = vmul.f32 0.00390625, %v621_v42  ;;  %v815_v34 = vsub.f32 %v2334_v4, %v2539_v38 }
 0x19d   : > { %v624_v3 = vpop.xlane.xlu1 %623  ;;  %v877_v40 = vmul.f32 %v2017_v55, %v813_v52  ;;  %v876_v6 = vmul.f32 %v2017_v55, %v812_v41  ;;  %v816_v35 = vsub.f32 %v2337_v7, %v2541_v44  ;;  %v817_v36 = vsub.f32 %v2339_v8, %v2541_v44 }
 0x19e   : > { %v846_v10 = vadd.f32 1e-05, %v798_v61  ;;  %v799_v11 = vmax.f32 %v783_v62, 0.0  ;;  %v2561_v46 = vmul.f32 0.00390625, %v624_v3  ;;  %v768_v53 = vmul.f32 %v2559_v2, %v2559_v2 }
 0x19f   : > { %v718_v51 = vpop.xlane.xlu0 %717  ;;  %v907_v14 = vpack.c.bf16 %v877_v40, %v875_v39  ;;  %v906_v18 = vpack.c.bf16 %v876_v6, %v874_v5 }
 0x1a0   : > { %2022 = vrsqrt.f32 %v846_v10  ;;  %v847_v49 = vadd.f32 1e-05, %v799_v11  ;;  %v752_v12 = vmul.f32 0.00390625, %v718_v51  ;;  %v769_v31 = vmul.f32 %v2561_v46, %v2561_v46 }
 0x1a1   : > { %v721_v26 = vpop.xlane.xlu1 %720  ;;  %1089 = vmatprep.mubr.bf16.mxu1 %v907_v14 }
 0x1a2   : > { %v2019_v19 = vpop.eup %2018  ;;  %2024 = vrsqrt.f32 %v847_v49  ;;  %v784_v25 = vsub.f32 %v752_v12, %v768_v53  ;;  %v753_v32 = vmul.f32 0.00390625, %v721_v26  ;;  %1090 = vmatmul.mubr.bf16.vlgmr.msra.gmra.mrb[0].mxu1 %v906_v18  ;;  %v818_v49 = vsub.f32 %v2355_v21, %v2547_v9 }
 0x1a3   : > { %v627_v37 = vpop.xlane.xlu0 %626  ;;  %v879_v61 = vmul.f32 %v2019_v19, %v815_v34  ;;  %v878_v3 = vmul.f32 %v2019_v19, %v814_v33  ;;  %v819_v53 = vsub.f32 %v2358_v24, %v2547_v9  ;;  %v820_v12 = vsub.f32 %v2361_v27, %v2549_v15 }
 0x1a4   : > { %v2021_v41 = vpop.eup %2020  ;;  %v800_v42 = vmax.f32 %v784_v25, 0.0  ;;  %v785_v45 = vsub.f32 %v753_v32, %v769_v31  ;;  %v2575_v52 = vmul.f32 0.00390625, %v627_v37  ;;  %v821_v26 = vsub.f32 %v2363_v28, %v2549_v15 }
 0x1a5   : > { %v630_v55 = vpop.xlane.xlu1 %629  ;;  %v881_v62 = vmul.f32 %v2021_v41, %v817_v36  ;;  %v880_v1 = vmul.f32 %v2021_v41, %v816_v35 }
 0x1a6   : > { %v848_v39 = vadd.f32 1e-05, %v800_v42  ;;  %v801_v40 = vmax.f32 %v785_v45, 0.0  ;;  %v2577_v4 = vmul.f32 0.00390625, %v630_v55  ;;  %v770_v44 = vmul.f32 %v2575_v52, %v2575_v52 }
 0x1a7   : > { %v724_v38 = vpop.xlane.xlu0 %723  ;;  %v909_v7 = vpack.c.bf16 %v881_v62, %v879_v61  ;;  %v908_v5 = vpack.c.bf16 %v880_v1, %v878_v3 }
 0x1a8   : > { %2026 = vrsqrt.f32 %v848_v39  ;;  %v849_v8 = vadd.f32 1e-05, %v801_v40  ;;  %v754_v6 = vmul.f32 0.00390625, %v724_v38  ;;  %v771_v14 = vmul.f32 %v2577_v4, %v2577_v4 }
 0x1a9   : > { %v727_v10 = vpop.xlane.xlu1 %726  ;;  %1097 = vmatprep.mubr.bf16.mxu1 %v909_v7  ;;  %v822_v40 = vsub.f32 %v2388_v47, %v2559_v2  ;;  %v823_v38 = vsub.f32 %v2394_v54, %v2559_v2  ;;  %v824_v7 = vsub.f32 %v2397_v57, %v2561_v46 }
 0x1aa   : > { %v2023_v11 = vpop.eup %2022  ;;  %2028 = vrsqrt.f32 %v849_v8  ;;  %v786_v51 = vsub.f32 %v754_v6, %v770_v44  ;;  %v755_v18 = vmul.f32 0.00390625, %v727_v10  ;;  %1098 = vmatmul.mubr.bf16.gmra.mrb[4].mxu1 %v908_v5  ;;  %v825_v5 = vsub.f32 %v2399_v58, %v2561_v46 }
 0x1ab   : > { %v633_v19 = vpop.xlane.xlu0 %632  ;;  %v883_v35 = vmul.f32 %v2023_v11, %v819_v53  ;;  %v882_v37 = vmul.f32 %v2023_v11, %v818_v49 }
 0x1ac   : > { %v2025_v25 = vpop.eup %2024  ;;  %v802_v31 = vmax.f32 %v786_v51, 0.0  ;;  %v787_v32 = vsub.f32 %v755_v18, %v771_v14  ;;  %v2591_v33 = vmul.f32 0.00390625, %v633_v19 }
 0x1ad   : > { %v636_v34 = vpop.xlane.xlu1 %635  ;;  %v885_v36 = vmul.f32 %v2025_v25, %v821_v26  ;;  %v884_v21 = vmul.f32 %v2025_v25, %v820_v12 }
 0x1ae   : > { %v850_v41 = vadd.f32 1e-05, %v802_v31  ;;  %v803_v42 = vmax.f32 %v787_v32, 0.0  ;;  %v2593_v24 = vmul.f32 0.00390625, %v636_v34  ;;  %v772_v15 = vmul.f32 %v2591_v33, %v2591_v33 }
 0x1af   : > { %v730_v9 = vpop.xlane.xlu0 %729  ;;  %v911_v27 = vpack.c.bf16 %v885_v36, %v883_v35  ;;  %v910_v45 = vpack.c.bf16 %v884_v21, %v882_v37  ;;  %v826_v36 = vsub.f32 %v2421_v13, %v2575_v52  ;;  %v827_v37 = vsub.f32 %v2427_v17, %v2575_v52 }
 0x1b0   : > { %2030 = vrsqrt.f32 %v850_v41  ;;  %v851_v28 = vadd.f32 1e-05, %v803_v42  ;;  %v756_v55 = vmul.f32 0.00390625, %v730_v9  ;;  %v773_v1 = vmul.f32 %v2593_v24, %v2593_v24 }
 0x1b1   : > { %v733_v61 = vpop.xlane.xlu1 %732  ;;  %1105 = vmatprep.mubr.bf16.mxu1 %v911_v27  ;;  %v828_v21 = vsub.f32 %v2433_v22, %v2577_v4  ;;  %v829_v41 = vsub.f32 %v2435_v23, %v2577_v4 }
 0x1b2   : > { %v2027_v62 = vpop.eup %2026  ;;  %2032 = vrsqrt.f32 %v851_v28  ;;  %v788_v3 = vsub.f32 %v756_v55, %v772_v15  ;;  %v757_v39 = vmul.f32 0.00390625, %v733_v61  ;;  %1106 = vmatmul.mubr.bf16.gmra.mrb[8].mxu1 %v910_v45 }
 0x1b3   : > { %v639_v8 = vpop.xlane.xlu0 %638  ;;  %v887_v14 = vmul.f32 %v2027_v62, %v823_v38  ;;  %v886_v49 = vmul.f32 %v2027_v62, %v822_v40 }
 0x1b4   : > { %v2029_v44 = vpop.eup %2028  ;;  %v804_v6 = vmax.f32 %v788_v3, 0.0  ;;  %v789_v10 = vsub.f32 %v757_v39, %v773_v1  ;;  %v2607_v11 = vmul.f32 0.00390625, %v639_v8 }
 0x1b5   : > { %v642_v51 = vpop.xlane.xlu1 %641  ;;  %v889_v18 = vmul.f32 %v2029_v44, %v825_v5  ;;  %v888_v47 = vmul.f32 %v2029_v44, %v824_v7 }
 0x1b6   : > { %v852_v53 = vadd.f32 1e-05, %v804_v6  ;;  %v805_v12 = vmax.f32 %v789_v10, 0.0  ;;  %v2609_v54 = vmul.f32 0.00390625, %v642_v51  ;;  %v774_v46 = vmul.f32 %v2607_v11, %v2607_v11 }
 0x1b7   : > { %v736_v2 = vpop.xlane.xlu0 %735  ;;  %v913_v57 = vpack.c.bf16 %v889_v18, %v887_v14  ;;  %v912_v26 = vpack.c.bf16 %v888_v47, %v886_v49  ;;  %v830_v6 = vsub.f32 %v2457_v43, %v2591_v33  ;;  %v831_v10 = vsub.f32 %v2463_v50, %v2591_v33 }
 0x1b8   : > { %2034 = vrsqrt.f32 %v852_v53  ;;  %v853_v58 = vadd.f32 1e-05, %v805_v12  ;;  %v758_v19 = vmul.f32 0.00390625, %v736_v2  ;;  %v775_v34 = vmul.f32 %v2609_v54, %v2609_v54 }
 0x1b9   : > { %v739_v25 = vpop.xlane.xlu1 %738  ;;  %1113 = vmatprep.mubr.bf16.mxu1 %v913_v57  ;;  %v832_v51 = vsub.f32 %v2469_v59, %v2593_v24  ;;  %v833_v14 = vsub.f32 %v2471_v60, %v2593_v24  ;;  %v834_v59 = vsub.f32 %v2493_v16, %v2607_v11  ;;  %v835_v60 = vsub.f32 %v2496_v20, %v2607_v11 }
 0x1ba   : > { %v2031_v31 = vpop.eup %2030  ;;  %2036 = vrsqrt.f32 %v853_v58  ;;  %v790_v32 = vsub.f32 %v758_v19, %v774_v46  ;;  %v759_v35 = vmul.f32 0.00390625, %v739_v25  ;;  %1114 = vmatmul.mubr.bf16.gmra.mrb[12].mxu1 %v912_v26  ;;  %v836_v33 = vsub.f32 %v2499_v29, %v2609_v54 }
 0x1bb   : > { %v645_v42 = vpop.xlane.xlu0 %644  ;;  %v891_v55 = vmul.f32 %v2031_v31, %v827_v37  ;;  %v890_v62 = vmul.f32 %v2031_v31, %v826_v36  ;;  %v837_v24 = vsub.f32 %v2501_v30, %v2609_v54 }
 0x1bc   : > { %v2033_v9 = vpop.eup %2032  ;;  %v806_v27 = vmax.f32 %v790_v32, 0.0  ;;  %v791_v45 = vsub.f32 %v759_v35, %v775_v34  ;;  %v2623_v28 = vmul.f32 0.00390625, %v645_v42 }
 0x1bd   : > { %v648_v15 = vpop.xlane.xlu1 %647  ;;  %v893_v61 = vmul.f32 %v2033_v9, %v829_v41  ;;  %v892_v13 = vmul.f32 %v2033_v9, %v828_v21 }
 0x1be   : > { %v854_v3 = vadd.f32 1e-05, %v806_v27  ;;  %v807_v1 = vmax.f32 %v791_v45, 0.0  ;;  %v665_v17 = vmul.f32 0.00390625, %v648_v15  ;;  %v776_v23 = vmul.f32 %v2623_v28, %v2623_v28  ;;  %v2664_v15 = vld [vmem:[%s2941_s4] ss:$0 sm:$0xff] }
 0x1bf   : > { %v742_v52 = vpop.xlane.xlu0 %741  ;;  %v915_v39 = vpack.c.bf16 %v893_v61, %v891_v55  ;;  %v914_v22 = vpack.c.bf16 %v892_v13, %v890_v62  ;;  %v838_v16 = vsub.f32 %v2517_v48, %v2623_v28  ;;  %v839_v20 = vsub.f32 %v2520_v56, %v2623_v28  ;;  %v2006_v48 = vld [vmem:[%s2942_s5] sm:$0xff]   ;;  %v2007_v56 = vld [vmem:[%s2942_s5 + $0x8] sm:$0xff]  }
 0x1c0   : > { %2038 = vrsqrt.f32 %v854_v3  ;;  %v855_v40 = vadd.f32 1e-05, %v807_v1  ;;  %v760_v4 = vmul.f32 0.00390625, %v742_v52  ;;  %v777_v8 = vmul.f32 %v665_v17, %v665_v17  ;;  %1886 = vmatprep.subr.bf16.mxu0 %v2006_v48 }
 0x1c1   : > { %v745_v38 = vpop.xlane.xlu1 %744  ;;  %1121 = vmatprep.mubr.bf16.mxu1 %v915_v39  ;;  %v840_v29 = vsub.f32 %v2523_v63, %v665_v17  ;;  %v841_v30 = vsub.f32 %v2525_v0, %v665_v17  ;;  %1887 = vmatpush3.bf16.msra.mxu0 %v2006_v48  ;;  %v2008_v63 = vld [vmem:[%s2942_s5 + $0x10] sm:$0xff]   ;;  %v2009_v0 = vld [vmem:[%s2942_s5 + $0x18] sm:$0xff]  }
 0x1c2   : > { %v2035_v7 = vpop.eup %2034  ;;  %2040 = vrsqrt.f32 %v855_v40  ;;  %v792_v5 = vsub.f32 %v760_v4, %v776_v23  ;;  %v761_v44 = vmul.f32 0.00390625, %v745_v38  ;;  %1122 = vmatmul.mubr.bf16.gmra.mrb[16].mxu1 %v914_v22  ;;  %1888 = vmatprep.subr.bf16.mxu0 %v2007_v56 }
 0x1c3   : > { %v895_v53 = vmul.f32 %v2035_v7, %v831_v10  ;;  %v894_v2 = vmul.f32 %v2035_v7, %v830_v6 }
 0x1c4   : > { %v2037_v18 = vpop.eup %2036  ;;  %v808_v49 = vmax.f32 %v792_v5, 0.0  ;;  %v793_v47 = vsub.f32 %v761_v44, %v777_v8 }
 0x1c5   : > { %v897_v12 = vmul.f32 %v2037_v18, %v833_v14  ;;  %v896_v57 = vmul.f32 %v2037_v18, %v832_v51  ;;  %1889 = vmatpush3.bf16.msra.mxu0 %v2007_v56 }
 0x1c6   : > { %v856_v26 = vadd.f32 1e-05, %v808_v49  ;;  %v809_v58 = vmax.f32 %v793_v47, 0.0  ;;  %1890 = vmatprep.subr.bf16.mxu0 %v2008_v63 }
 0x1c7   : > { %v917_v46 = vpack.c.bf16 %v897_v12, %v895_v53  ;;  %v916_v43 = vpack.c.bf16 %v896_v57, %v894_v2 }
 0x1c8   : > { %2042 = vrsqrt.f32 %v856_v26  ;;  %v857_v19 = vadd.f32 1e-05, %v809_v58 }
 0x1c9   : > { %1129 = vmatprep.mubr.bf16.mxu1 %v917_v46  ;;  %1891 = vmatpush3.bf16.msra.mxu0 %v2008_v63 }
 0x1ca   : > { %v2039_v50 = vpop.eup %2038  ;;  %2044 = vrsqrt.f32 %v857_v19  ;;  %1130 = vmatmul.mubr.bf16.gmra.mrb[20].mxu1 %v916_v43  ;;  %1892 = vmatprep.subr.bf16.mxu0 %v2009_v0 }
 0x1cb   : > { %v899_v31 = vmul.f32 %v2039_v50, %v835_v60  ;;  %v898_v34 = vmul.f32 %v2039_v50, %v834_v59 }
 0x1cc   : > { %v2041_v25 = vpop.eup %2040 }
 0x1cd   : > { %v901_v32 = vmul.f32 %v2041_v25, %v837_v24  ;;  %v900_v35 = vmul.f32 %v2041_v25, %v836_v33  ;;  %1893 = vmatpush3.bf16.msra.mxu0 %v2009_v0 }
 0x1cf   : > { %v919_v36 = vpack.c.bf16 %v901_v32, %v899_v31  ;;  %v918_v37 = vpack.c.bf16 %v900_v35, %v898_v34 }
 0x1d1   : > { %1137 = vmatprep.mubr.bf16.mxu1 %v919_v36 }
 0x1d2   : > { %v2043_v21 = vpop.eup %2042  ;;  %1138 = vmatmul.mubr.bf16.gmra.mrb[24].mxu1 %v918_v37 }
 0x1d3   : > { %v903_v54 = vmul.f32 %v2043_v21, %v839_v20  ;;  %v902_v42 = vmul.f32 %v2043_v21, %v838_v16 }
 0x1d4   : > { %v2045_v11 = vpop.eup %2044 }
 0x1d5   : > { %v905_v41 = vmul.f32 %v2045_v11, %v841_v30  ;;  %v904_v9 = vmul.f32 %v2045_v11, %v840_v29  ;;  %v2010_v30 = vld [vmem:[%s2942_s5 + $0x20] sm:$0xff]  }
 0x1d6   : > { %1894 = vmatprep.subr.bf16.mxu0 %v2010_v30 }
 0x1d7   : > { %v921_v27 = vpack.c.bf16 %v905_v41, %v903_v54  ;;  %v920_v45 = vpack.c.bf16 %v904_v9, %v902_v42  ;;  %1895 = vmatpush3.bf16.msra.mxu0 %v2010_v30 }
 0x1d9   : > { %1145 = vmatprep.mubr.bf16.mxu1 %v921_v27 }
 0x1da   : > { %1146 = vmatmul.mubr.bf16.gmra.mrb[28].mxu1 %v920_v45 }
 0x275   : > { %v1813_v28 = vpop.f32.mrb[0].mxu1 }
 0x276   : > { %v1814_v55 = vpop.f32.mrb[1].mxu1 }
 0x277   : > { %v1815_v61 = vadd.f32 %v1814_v55, %v1813_v28  ;;  %v1816_v62 = vpop.f32.mrb[2].mxu1  ;;  %v2011_v55 = vld [vmem:[%s2942_s5 + $0x28] sm:$0xff]  }
 0x278   : > { %v1817_v13 = vpop.f32.mrb[3].mxu1  ;;  %1896 = vmatprep.subr.bf16.mxu0 %v2011_v55 }
 0x279   : > { %v1092_v3 = vadd.f32 %v1815_v61, %v2664_v15  ;;  %v1818_v1 = vadd.f32 %v1817_v13, %v1816_v62  ;;  %1897 = vmatpush3.bf16.msra.mxu0 %v2011_v55 }
 0x27b   : > { %v2667_v17 = vmax.f32 %v1092_v3, 0.0  ;;  %v1095_v52 = vadd.f32 %v1818_v1, %v2664_v15 }
 0x27d   : > { %v2670_v39 = vmax.f32 %v1095_v52, 0.0  ;;  %1170 = vadd.xlane.f32.xlu0 %v2667_v17  ;;  %v1819_v22 = vpop.f32.mrb[4].mxu1  ;;  %v1219_v38 = vmul.f32 %v2667_v17, %v2667_v17 }
 0x27e   : > { %v1820_v40 = vpop.f32.mrb[5].mxu1 }
 0x27f   : > { %v1821_v23 = vadd.f32 %v1820_v40, %v1819_v22  ;;  %1172 = vadd.xlane.f32.xlu1 %v2670_v39  ;;  %v1822_v4 = vpop.f32.mrb[6].mxu1  ;;  %v1220_v44 = vmul.f32 %v2670_v39, %v2670_v39 }
 0x280   : > { %v1823_v7 = vpop.f32.mrb[7].mxu1 }
 0x281   : > { %v1100_v5 = vadd.f32 %v1821_v23, %v2664_v15  ;;  %v1824_v8 = vadd.f32 %v1823_v7, %v1822_v4  ;;  %1235 = vadd.xlane.f32.xlu0 %v1219_v38 }
 0x283   : > { %v2679_v6 = vmax.f32 %v1100_v5, 0.0  ;;  %v1103_v10 = vadd.f32 %v1824_v8, %v2664_v15  ;;  %1237 = vadd.xlane.f32.xlu1 %v1220_v44  ;;  %v2012_v5 = vld [vmem:[%s2942_s5 + $0x30] sm:$0xff]  }
 0x284   : > { %1898 = vmatprep.subr.bf16.mxu0 %v2012_v5 }
 0x285   : > { %v2682_v51 = vmax.f32 %v1103_v10, 0.0  ;;  %1174 = vadd.xlane.f32.xlu0 %v2679_v6  ;;  %v1825_v14 = vpop.f32.mrb[8].mxu1  ;;  %v1221_v53 = vmul.f32 %v2679_v6, %v2679_v6  ;;  %1899 = vmatpush3.bf16.msra.mxu0 %v2012_v5 }
 0x286   : > { %v1826_v18 = vpop.f32.mrb[9].mxu1 }
 0x287   : > { %v1827_v49 = vadd.f32 %v1826_v18, %v1825_v14  ;;  %1176 = vadd.xlane.f32.xlu1 %v2682_v51  ;;  %v1828_v47 = vpop.f32.mrb[10].mxu1  ;;  %v1222_v26 = vmul.f32 %v2682_v51, %v2682_v51 }
 0x288   : > { %v1829_v12 = vpop.f32.mrb[11].mxu1 }
 0x289   : > { %v1108_v2 = vadd.f32 %v1827_v49, %v2664_v15  ;;  %v1830_v57 = vadd.f32 %v1829_v12, %v1828_v47  ;;  %1239 = vadd.xlane.f32.xlu0 %v1221_v53  ;;  %v2013_v47 = vld [vmem:[%s2942_s5 + $0x38] sm:$0xff]  }
 0x28a   : > { %1900 = vmatprep.subr.bf16.mxu0 %v2013_v47 }
 0x28b   : > { %v2691_v58 = vmax.f32 %v1108_v2, 0.0  ;;  %v1111_v46 = vadd.f32 %v1830_v57, %v2664_v15  ;;  %1241 = vadd.xlane.f32.xlu1 %v1222_v26  ;;  %1901 = vmatpush3.bf16.msra.mxu0 %v2013_v47 }
 0x28d   : > { %v2694_v43 = vmax.f32 %v1111_v46, 0.0  ;;  %1178 = vadd.xlane.f32.xlu0 %v2691_v58  ;;  %v1831_v19 = vpop.f32.mrb[12].mxu1  ;;  %v1223_v33 = vmul.f32 %v2691_v58, %v2691_v58 }
 0x28e   : > { %v1832_v50 = vpop.f32.mrb[13].mxu1 }
 0x28f   : > { %v1833_v59 = vadd.f32 %v1832_v50, %v1831_v19  ;;  %1180 = vadd.xlane.f32.xlu1 %v2694_v43  ;;  %v1834_v60 = vpop.f32.mrb[14].mxu1  ;;  %v1224_v32 = vmul.f32 %v2694_v43, %v2694_v43 }
 0x290   : > { %v1835_v24 = vpop.f32.mrb[15].mxu1 }
 0x291   : > { %v1116_v25 = vadd.f32 %v1833_v59, %v2664_v15  ;;  %v1836_v31 = vadd.f32 %v1835_v24, %v1834_v60  ;;  %1243 = vadd.xlane.f32.xlu0 %v1223_v33 }
 0x293   : > { %v2703_v34 = vmax.f32 %v1116_v25, 0.0  ;;  %v1119_v35 = vadd.f32 %v1836_v31, %v2664_v15  ;;  %1245 = vadd.xlane.f32.xlu1 %v1224_v32 }
 0x295   : > { %v2706_v36 = vmax.f32 %v1119_v35, 0.0  ;;  %1182 = vadd.xlane.f32.xlu0 %v2703_v34  ;;  %v1837_v37 = vpop.f32.mrb[16].mxu1  ;;  %v1225_v29 = vmul.f32 %v2703_v34, %v2703_v34 }
 0x296   : > { %v1838_v21 = vpop.f32.mrb[17].mxu1 }
 0x297   : > { %v1839_v16 = vadd.f32 %v1838_v21, %v1837_v37  ;;  %1184 = vadd.xlane.f32.xlu1 %v2706_v36  ;;  %v1840_v20 = vpop.f32.mrb[18].mxu1  ;;  %v1226_v42 = vmul.f32 %v2706_v36, %v2706_v36 }
 0x298   : > { %v1841_v11 = vpop.f32.mrb[19].mxu1 }
 0x299   : > { %v1124_v54 = vadd.f32 %v1839_v16, %v2664_v15  ;;  %v1842_v41 = vadd.f32 %v1841_v11, %v1840_v20  ;;  %1247 = vadd.xlane.f32.xlu0 %v1225_v29 }
 0x29b   : > { %v2718_v9 = vmax.f32 %v1124_v54, 0.0  ;;  %v1127_v27 = vadd.f32 %v1842_v41, %v2664_v15  ;;  %1249 = vadd.xlane.f32.xlu1 %v1226_v42 }
 0x29d   : > { %v2721_v45 = vmax.f32 %v1127_v27, 0.0  ;;  %1186 = vadd.xlane.f32.xlu0 %v2718_v9  ;;  %v1843_v48 = vpop.f32.mrb[20].mxu1  ;;  %v1227_v28 = vmul.f32 %v2718_v9, %v2718_v9 }
 0x29e   : > { %v1844_v56 = vpop.f32.mrb[21].mxu1 }
 0x29f   : > { %v1845_v63 = vadd.f32 %v1844_v56, %v1843_v48  ;;  %1188 = vadd.xlane.f32.xlu1 %v2721_v45  ;;  %v1846_v0 = vpop.f32.mrb[22].mxu1  ;;  %v1228_v3 = vmul.f32 %v2721_v45, %v2721_v45 }
 0x2a0   : > { %v1847_v61 = vpop.f32.mrb[23].mxu1 }
 0x2a1   : > { %v1132_v62 = vadd.f32 %v1845_v63, %v2664_v15  ;;  %v1848_v13 = vadd.f32 %v1847_v61, %v1846_v0  ;;  %1251 = vadd.xlane.f32.xlu0 %v1227_v28 }
 0x2a3   : > { %v2733_v1 = vmax.f32 %v1132_v62, 0.0  ;;  %v1135_v52 = vadd.f32 %v1848_v13, %v2664_v15  ;;  %1253 = vadd.xlane.f32.xlu1 %v1228_v3 }
 0x2a5   : > { %v2736_v22 = vmax.f32 %v1135_v52, 0.0  ;;  %1190 = vadd.xlane.f32.xlu0 %v2733_v1  ;;  %v1849_v40 = vpop.f32.mrb[24].mxu1  ;;  %v1229_v7 = vmul.f32 %v2733_v1, %v2733_v1 }
 0x2a6   : > { %v1850_v23 = vpop.f32.mrb[25].mxu1 }
 0x2a7   : > { %v1851_v4 = vadd.f32 %v1850_v23, %v1849_v40  ;;  %1192 = vadd.xlane.f32.xlu1 %v2736_v22  ;;  %v1852_v38 = vpop.f32.mrb[26].mxu1  ;;  %v1230_v14 = vmul.f32 %v2736_v22, %v2736_v22 }
 0x2a8   : > { %v1853_v8 = vpop.f32.mrb[27].mxu1 }
 0x2a9   : > { %v1140_v44 = vadd.f32 %v1851_v4, %v2664_v15  ;;  %v1854_v10 = vadd.f32 %v1853_v8, %v1852_v38  ;;  %1255 = vadd.xlane.f32.xlu0 %v1229_v7 }
 0x2ab   : > { %v2748_v18 = vmax.f32 %v1140_v44, 0.0  ;;  %v1143_v49 = vadd.f32 %v1854_v10, %v2664_v15  ;;  %1257 = vadd.xlane.f32.xlu1 %v1230_v14 }
 0x2ad   : > { %v2754_v53 = vmax.f32 %v1143_v49, 0.0  ;;  %1194 = vadd.xlane.f32.xlu0 %v2748_v18  ;;  %v1855_v12 = vpop.f32.mrb[28].mxu1  ;;  %v1231_v46 = vmul.f32 %v2748_v18, %v2748_v18 }
 0x2ae   : > { %v1856_v2 = vpop.f32.mrb[29].mxu1 }
 0x2af   : > { %v1857_v57 = vadd.f32 %v1856_v2, %v1855_v12  ;;  %1196 = vadd.xlane.f32.xlu1 %v2754_v53  ;;  %v1858_v26 = vpop.f32.mrb[30].mxu1  ;;  %v1232_v60 = vmul.f32 %v2754_v53, %v2754_v53 }
 0x2b0   : > { %v1859_v19 = vpop.f32.mrb[31].mxu1 }
 0x2b1   : > { %v1148_v50 = vadd.f32 %v1857_v57, %v2664_v15  ;;  %v1860_v59 = vadd.f32 %v1859_v19, %v1858_v26  ;;  %1259 = vadd.xlane.f32.xlu0 %v1231_v46 }
 0x2b3   : > { %v2763_v33 = vmax.f32 %v1148_v50, 0.0  ;;  %v1151_v24 = vadd.f32 %v1860_v59, %v2664_v15  ;;  %1261 = vadd.xlane.f32.xlu1 %v1232_v60 }
 0x2b5   : > { %v2766_v25 = vmax.f32 %v1151_v24, 0.0  ;;  %1198 = vadd.xlane.f32.xlu0 %v2763_v33  ;;  %v1233_v31 = vmul.f32 %v2763_v33, %v2763_v33 }
 0x2b7   : > { %1200 = vadd.xlane.f32.xlu1 %v2766_v25  ;;  %v1234_v32 = vmul.f32 %v2766_v25, %v2766_v25 }
 0x2b9   : > { %1263 = vadd.xlane.f32.xlu0 %v1233_v31 }
 0x2bb   : > { %1265 = vadd.xlane.f32.xlu1 %v1234_v32 }
 0x30a   : > { %v1171_v35 = vpop.xlane.xlu0 %1170 }
 0x30b   : > { %v1203_v37 = vmul.f32 0.0078125, %v1171_v35 }
 0x30c   : > { %v1173_v21 = vpop.xlane.xlu1 %1172 }
 0x30d   : > { %v1204_v16 = vmul.f32 0.0078125, %v1173_v21  ;;  %v1283_v20 = vmul.f32 %v1203_v37, %v1203_v37  ;;  %v1331_v60 = vsub.f32 %v2667_v17, %v1203_v37 }
 0x30e   : > { %v1236_v15 = vpop.xlane.xlu0 %1235 }
 0x30f   : > { %v1267_v29 = vmul.f32 0.0078125, %v1236_v15  ;;  %v1284_v11 = vmul.f32 %v1204_v16, %v1204_v16  ;;  %v1332_v24 = vsub.f32 %v2670_v39, %v1204_v16 }
 0x310   : > { %v1238_v30 = vpop.xlane.xlu1 %1237 }
 0x311   : > { %v1299_v54 = vsub.f32 %v1267_v29, %v1283_v20  ;;  %v1268_v41 = vmul.f32 0.0078125, %v1238_v30 }
 0x312   : > { %v1175_v42 = vpop.xlane.xlu0 %1174 }
 0x313   : > { %v1315_v27 = vmax.f32 %v1299_v54, 0.0  ;;  %v1300_v48 = vsub.f32 %v1268_v41, %v1284_v11  ;;  %v2774_v56 = vmul.f32 0.0078125, %v1175_v42 }
 0x314   : > { %v1177_v63 = vpop.xlane.xlu1 %1176 }
 0x315   : > { %v1347_v0 = vadd.f32 1e-05, %v1315_v27  ;;  %v1316_v28 = vmax.f32 %v1300_v48, 0.0  ;;  %v2776_v55 = vmul.f32 0.0078125, %v1177_v63  ;;  %v1285_v13 = vmul.f32 %v2774_v56, %v2774_v56 }
 0x316   : > { %v1240_v61 = vpop.xlane.xlu0 %1239 }
 0x317   : > { %2046 = vrsqrt.f32 %v1347_v0  ;;  %v1348_v62 = vadd.f32 1e-05, %v1316_v28  ;;  %v1269_v3 = vmul.f32 0.0078125, %v1240_v61  ;;  %v1286_v40 = vmul.f32 %v2776_v55, %v2776_v55 }
 0x318   : > { %v1242_v52 = vpop.xlane.xlu1 %1241  ;;  %v1333_v61 = vsub.f32 %v2679_v6, %v2774_v56 }
 0x319   : > { %2048 = vrsqrt.f32 %v1348_v62  ;;  %v1301_v23 = vsub.f32 %v1269_v3, %v1285_v13  ;;  %v1270_v4 = vmul.f32 0.0078125, %v1242_v52  ;;  %v1334_v62 = vsub.f32 %v2682_v51, %v2776_v55 }
 0x31a   : > { %v1179_v38 = vpop.xlane.xlu0 %1178 }
 0x31b   : > { %v1317_v7 = vmax.f32 %v1301_v23, 0.0  ;;  %v1302_v5 = vsub.f32 %v1270_v4, %v1286_v40  ;;  %v2782_v8 = vmul.f32 0.0078125, %v1179_v38 }
 0x31c   : > { %v1181_v44 = vpop.xlane.xlu1 %1180 }
 0x31d   : > { %v1349_v10 = vadd.f32 1e-05, %v1317_v7  ;;  %v1318_v14 = vmax.f32 %v1302_v5, 0.0  ;;  %v2784_v49 = vmul.f32 0.0078125, %v1181_v44  ;;  %v1287_v2 = vmul.f32 %v2782_v8, %v2782_v8 }
 0x31e   : > { %v1244_v47 = vpop.xlane.xlu0 %1243 }
 0x31f   : > { %2050 = vrsqrt.f32 %v1349_v10  ;;  %v1350_v12 = vadd.f32 1e-05, %v1318_v14  ;;  %v1271_v57 = vmul.f32 0.0078125, %v1244_v47  ;;  %v1288_v19 = vmul.f32 %v2784_v49, %v2784_v49 }
 0x320   : > { %v1246_v26 = vpop.xlane.xlu1 %1245 }
 0x321   : > { %v2047_v46 = vpop.eup %2046  ;;  %2052 = vrsqrt.f32 %v1350_v12  ;;  %v1303_v50 = vsub.f32 %v1271_v57, %v1287_v2  ;;  %v1272_v59 = vmul.f32 0.0078125, %v1246_v26 }
 0x322   : > { %v1183_v31 = vpop.xlane.xlu0 %1182  ;;  %v1379_v29 = vmul.f32 %v2047_v46, %v1331_v60  ;;  %v1335_v46 = vsub.f32 %v2691_v58, %v2782_v8 }
 0x323   : > { %v2049_v32 = vpop.eup %2048  ;;  %v1319_v35 = vmax.f32 %v1303_v50, 0.0  ;;  %v1304_v21 = vsub.f32 %v1272_v59, %v1288_v19  ;;  %v2792_v15 = vmul.f32 0.0078125, %v1183_v31  ;;  %v1336_v19 = vsub.f32 %v2694_v43, %v2784_v49 }
 0x324   : > { %v1185_v20 = vpop.xlane.xlu1 %1184  ;;  %v1380_v30 = vmul.f32 %v2049_v32, %v1332_v24 }
 0x325   : > { %v1351_v11 = vadd.f32 1e-05, %v1319_v35  ;;  %v1320_v54 = vmax.f32 %v1304_v21, 0.0  ;;  %v2794_v41 = vmul.f32 0.0078125, %v1185_v20  ;;  %v1289_v17 = vmul.f32 %v2792_v15, %v2792_v15 }
 0x326   : > { %v1248_v42 = vpop.xlane.xlu0 %1247  ;;  %v1395_v27 = vpack.c.bf16 %v1380_v30, %v1379_v29 }
 0x327   : > { %2054 = vrsqrt.f32 %v1351_v11  ;;  %v1352_v48 = vadd.f32 1e-05, %v1320_v54  ;;  %v1273_v39 = vmul.f32 0.0078125, %v1248_v42  ;;  %v1290_v63 = vmul.f32 %v2794_v41, %v2794_v41 }
 0x328   : > { %v1250_v37 = vpop.xlane.xlu1 %1249  ;;  %1902 = vmatprep.mubr.bf16.mxu0 %v1395_v27 }
 0x329   : > { %v2051_v16 = vpop.eup %2050  ;;  %2056 = vrsqrt.f32 %v1352_v48  ;;  %v1305_v0 = vsub.f32 %v1273_v39, %v1289_v17  ;;  %v1274_v28 = vmul.f32 0.0078125, %v1250_v37  ;;  %v1337_v39 = vsub.f32 %v2703_v34, %v2792_v15 }
 0x32a   : > { %v1187_v13 = vpop.xlane.xlu0 %1186  ;;  %v1381_v38 = vmul.f32 %v2051_v16, %v1333_v61  ;;  %v1338_v37 = vsub.f32 %v2706_v36, %v2794_v41 }
 0x32b   : > { %v2053_v3 = vpop.eup %2052  ;;  %v1321_v52 = vmax.f32 %v1305_v0, 0.0  ;;  %v1306_v40 = vsub.f32 %v1274_v28, %v1290_v63  ;;  %v2804_v23 = vmul.f32 0.0078125, %v1187_v13 }
 0x32c   : > { %v1189_v4 = vpop.xlane.xlu1 %1188  ;;  %v1382_v7 = vmul.f32 %v2053_v3, %v1334_v62 }
 0x32d   : > { %v1353_v5 = vadd.f32 1e-05, %v1321_v52  ;;  %v1322_v44 = vmax.f32 %v1306_v40, 0.0  ;;  %v2806_v10 = vmul.f32 0.0078125, %v1189_v4  ;;  %v1291_v51 = vmul.f32 %v2804_v23, %v2804_v23 }
 0x32e   : > { %v1252_v14 = vpop.xlane.xlu0 %1251  ;;  %v1396_v47 = vpack.c.bf16 %v1382_v7, %v1381_v38 }
 0x32f   : > { %2058 = vrsqrt.f32 %v1353_v5  ;;  %v1354_v6 = vadd.f32 1e-05, %v1322_v44  ;;  %v1275_v56 = vmul.f32 0.0078125, %v1252_v14  ;;  %v1292_v2 = vmul.f32 %v2806_v10, %v2806_v10 }
 0x330   : > { %v1254_v55 = vpop.xlane.xlu1 %1253  ;;  %1903 = vmatmul.mubr.bf16.vlgmr.msra.gmra.mrb[32].mxu0 %v1396_v47 }
 0x331   : > { %v2055_v12 = vpop.eup %2054  ;;  %2060 = vrsqrt.f32 %v1354_v6  ;;  %v1307_v57 = vsub.f32 %v1275_v56, %v1291_v51  ;;  %v1276_v26 = vmul.f32 0.0078125, %v1254_v55  ;;  %v1339_v6 = vsub.f32 %v2718_v9, %v2804_v23 }
 0x332   : > { %v1191_v50 = vpop.xlane.xlu0 %1190  ;;  %v1383_v35 = vmul.f32 %v2055_v12, %v1335_v46  ;;  %v1340_v51 = vsub.f32 %v2721_v45, %v2806_v10 }
 0x333   : > { %v2057_v59 = vpop.eup %2056  ;;  %v1323_v60 = vmax.f32 %v1307_v57, 0.0  ;;  %v1308_v24 = vsub.f32 %v1276_v26, %v1292_v2  ;;  %v2816_v31 = vmul.f32 0.0078125, %v1191_v50 }
 0x334   : > { %v1193_v32 = vpop.xlane.xlu1 %1192  ;;  %v1384_v21 = vmul.f32 %v2057_v59, %v1336_v19 }
 0x335   : > { %v1355_v20 = vadd.f32 1e-05, %v1323_v60  ;;  %v1324_v29 = vmax.f32 %v1308_v24, 0.0  ;;  %v2818_v30 = vmul.f32 0.0078125, %v1193_v32  ;;  %v1293_v43 = vmul.f32 %v2816_v31, %v2816_v31 }
 0x336   : > { %v1256_v11 = vpop.xlane.xlu0 %1255  ;;  %v1397_v54 = vpack.c.bf16 %v1384_v21, %v1383_v35 }
 0x337   : > { %2062 = vrsqrt.f32 %v1355_v20  ;;  %v1356_v58 = vadd.f32 1e-05, %v1324_v29  ;;  %v1277_v8 = vmul.f32 0.0078125, %v1256_v11  ;;  %v1294_v27 = vmul.f32 %v2818_v30, %v2818_v30 }
 0x338   : > { %v1258_v49 = vpop.xlane.xlu1 %1257  ;;  %1906 = vmatprep.mubr.bf16.mxu0 %v1397_v54  ;;  %v1341_v11 = vsub.f32 %v2733_v1, %v2816_v31  ;;  %v1342_v54 = vsub.f32 %v2736_v22, %v2818_v30 }
 0x339   : > { %v2059_v42 = vpop.eup %2058  ;;  %2064 = vrsqrt.f32 %v1356_v58  ;;  %v1309_v48 = vsub.f32 %v1277_v8, %v1293_v43  ;;  %v1278_v17 = vmul.f32 0.0078125, %v1258_v49 }
 0x33a   : > { %v1195_v16 = vpop.xlane.xlu0 %1194  ;;  %v1385_v13 = vmul.f32 %v2059_v42, %v1337_v39 }
 0x33b   : > { %v2061_v63 = vpop.eup %2060  ;;  %v1325_v0 = vmax.f32 %v1309_v48, 0.0  ;;  %v1310_v28 = vsub.f32 %v1278_v17, %v1294_v27  ;;  %v2828_v61 = vmul.f32 0.0078125, %v1195_v16 }
 0x33c   : > { %v1197_v62 = vpop.xlane.xlu1 %1196  ;;  %v1386_v3 = vmul.f32 %v2061_v63, %v1338_v37 }
 0x33d   : > { %v1357_v52 = vadd.f32 1e-05, %v1325_v0  ;;  %v1326_v40 = vmax.f32 %v1310_v28, 0.0  ;;  %v1216_v4 = vmul.f32 0.0078125, %v1197_v62  ;;  %v1295_v34 = vmul.f32 %v2828_v61, %v2828_v61 }
 0x33e   : > { %v1260_v38 = vpop.xlane.xlu0 %1259  ;;  %v1398_v7 = vpack.c.bf16 %v1386_v3, %v1385_v13  ;;  %v1343_v16 = vsub.f32 %v2748_v18, %v2828_v61  ;;  %v1596_v18 = vld [vmem:[%s2945_s8] sm:$0x7] }
 0x33f   : > { %2066 = vrsqrt.f32 %v1357_v52  ;;  %v1358_v5 = vadd.f32 1e-05, %v1326_v40  ;;  %v1279_v36 = vmul.f32 0.0078125, %v1260_v38  ;;  %v1296_v44 = vmul.f32 %v1216_v4, %v1216_v4  ;;  %1599 = vperm.xlu0 %1980, %v1596_v18  }
 0x340   : > { %v1262_v15 = vpop.xlane.xlu1 %1261  ;;  %1907 = vmatmul.mubr.bf16.gmra.mrb[36].mxu0 %v1398_v7  ;;  %v1344_v1 = vsub.f32 %v2754_v53, %v1216_v4  ;;  %v2143_v38 = vmov 0.0   ;;  %v2853_v53 = vld [vmem:[%s2943_s6] ss:$0 sm:$0xff] }
 0x341   : > { %v2063_v41 = vpop.eup %2062  ;;  %2068 = vrsqrt.f32 %v1358_v5  ;;  %v1311_v14 = vsub.f32 %v1279_v36, %v1295_v34  ;;  %v1280_v47 = vmul.f32 0.0078125, %v1262_v15  ;;  %1918 = vmatprep.subr.bf16.mxu1 %v2143_v38  ;;  %1934 = vmatprep.mubr.msk.bf16.mxu1 %vm2144_vm2, %v2143_v38 }
 0x342   : > { %v1199_v56 = vpop.xlane.xlu0 %1198  ;;  %v1387_v46 = vmul.f32 %v2063_v41, %v1339_v6 }
 0x343   : > { %v2065_v55 = vpop.eup %2064  ;;  %v1327_v12 = vmax.f32 %v1311_v14, 0.0  ;;  %v1312_v2 = vsub.f32 %v1280_v47, %v1296_v44  ;;  %v1217_v57 = vmul.f32 0.0078125, %v1199_v56 }
 0x344   : > { %v1201_v26 = vpop.xlane.xlu1 %1200  ;;  %v1388_v19 = vmul.f32 %v2065_v55, %v1340_v51 }
 0x345   : > { %v1359_v50 = vadd.f32 1e-05, %v1327_v12  ;;  %v1328_v59 = vmax.f32 %v1312_v2, 0.0  ;;  %v1218_v60 = vmul.f32 0.0078125, %v1201_v26  ;;  %v1297_v21 = vmul.f32 %v1217_v57, %v1217_v57 }
 0x346   : > { %v1264_v24 = vpop.xlane.xlu0 %1263  ;;  %v1399_v32 = vpack.c.bf16 %v1388_v19, %v1387_v46  ;;  %v1345_v28 = vsub.f32 %v2763_v33, %v1217_v57 }
 0x347   : > { %2070 = vrsqrt.f32 %v1359_v50  ;;  %v1360_v35 = vadd.f32 1e-05, %v1328_v59  ;;  %v1281_v9 = vmul.f32 0.0078125, %v1264_v24  ;;  %v1298_v10 = vmul.f32 %v1218_v60, %v1218_v60 }
 0x348   : > { %v1266_v23 = vpop.xlane.xlu1 %1265  ;;  %1910 = vmatprep.mubr.bf16.mxu0 %v1399_v32  ;;  %v1346_v62 = vsub.f32 %v2766_v25, %v1218_v60 }
 0x349   : > { %v2067_v45 = vpop.eup %2066  ;;  %2072 = vrsqrt.f32 %v1360_v35  ;;  %v1313_v20 = vsub.f32 %v1281_v9, %v1297_v21  ;;  %v1282_v29 = vmul.f32 0.0078125, %v1266_v23 }
 0x34a   : > { %v1389_v49 = vmul.f32 %v2067_v45, %v1341_v11 }
 0x34b   : > { %v2069_v58 = vpop.eup %2068  ;;  %v1329_v43 = vmax.f32 %v1313_v20, 0.0  ;;  %v1314_v8 = vsub.f32 %v1282_v29, %v1298_v10 }
 0x34c   : > { %v1390_v42 = vmul.f32 %v2069_v58, %v1342_v54 }
 0x34d   : > { %v1361_v27 = vadd.f32 1e-05, %v1329_v43  ;;  %v1330_v48 = vmax.f32 %v1314_v8, 0.0 }
 0x34e   : > { %v1400_v17 = vpack.c.bf16 %v1390_v42, %v1389_v49 }
 0x34f   : > { %2074 = vrsqrt.f32 %v1361_v27  ;;  %v1362_v39 = vadd.f32 1e-05, %v1330_v48 }
 0x350   : > { %1911 = vmatmul.mubr.bf16.gmra.mrb[40].mxu0 %v1400_v17 }
 0x351   : > { %v2071_v37 = vpop.eup %2070  ;;  %2076 = vrsqrt.f32 %v1362_v39 }
 0x352   : > { %v1391_v22 = vmul.f32 %v2071_v37, %v1343_v16 }
 0x353   : > { %v2073_v31 = vpop.eup %2072 }
 0x354   : > { %v1392_v30 = vmul.f32 %v2073_v31, %v1344_v1 }
 0x356   : > { %v1401_v63 = vpack.c.bf16 %v1392_v30, %v1391_v22 }
 0x358   : > { %1914 = vmatprep.mubr.bf16.mxu0 %v1401_v63 }
 0x359   : > { %v2075_v0 = vpop.eup %2074 }
 0x35a   : > { %v1393_v3 = vmul.f32 %v2075_v0, %v1345_v28 }
 0x35b   : > { %v2077_v13 = vpop.eup %2076 }
 0x35c   : > { %v1394_v52 = vmul.f32 %v2077_v13, %v1346_v62 }
 0x35e   : > { %v1402_v40 = vpack.c.bf16 %v1394_v52, %v1393_v3 }
 0x360   : > { %1915 = vmatmul.mubr.bf16.gmra.mrb[44].mxu0 %v1402_v40 }
 0x403   : > { %v1904_v33 = vpop.f32.mrb[32].mxu0 }
 0x404   : > { %v1517_v25 = vadd.f32 %v1904_v33, %v2853_v53  ;;  %v1508_v61 = vpop.f32.mrb[33].mxu0 }
 0x405   : > { %v1509_v4 = vadd.f32 %v2853_v53, %v1508_v61  ;;  %v1905_v7 = vpop.f32.mrb[34].mxu0  ;;  %v1600_v61 = vpop.permute.xlu0 %1599 }
 0x406   : > { %v1520_v5 = vadd.f32 %v1905_v7, %v2853_v53  ;;  %v1511_v34 = vpop.f32.mrb[35].mxu0  ;;  %v1573_v15 = vmax.f32 %v1517_v25, 0.0 }
 0x407   : > { %v1512_v36 = vadd.f32 %v2853_v53, %v1511_v34  ;;  %v1571_v44 = vmax.f32 %v1509_v4, 0.0 }
 0x408   : > { %v1574_v41 = vmax.f32 %v1520_v5, 0.0 }
 0x409   : > { %v1572_v14 = vmax.f32 %v1512_v36, 0.0 }
 0x40a   : > { %v1588_v47 = vpack.c.bf16 %v1574_v41, %v1573_v15 }
 0x40b   : > { %v1587_v6 = vpack.c.bf16 %v1572_v14, %v1571_v44 }
 0x40c   : > { %v1610_v26 = vsel %vm1602_vm3, %v1588_v47, 0 }
 0x40d   : > { %v1607_v51 = vsel %vm1602_vm3, %v1587_v6, 0 }
 0x40e   : > { %1919 = vmatpush3.bf16.xpose.msra.mxu1 %v1607_v51 }
 0x40f   : > { %1920 = vmatprep.subr.bf16.mxu1 %v2143_v38 }
 0x413   : > { %v1908_v56 = vpop.f32.mrb[36].mxu0 }
 0x414   : > { %v1533_v55 = vadd.f32 %v1908_v56, %v2853_v53  ;;  %v1524_v12 = vpop.f32.mrb[37].mxu0 }
 0x415   : > { %v1525_v2 = vadd.f32 %v2853_v53, %v1524_v12  ;;  %v1909_v57 = vpop.f32.mrb[38].mxu0 }
 0x416   : > { %v1536_v46 = vadd.f32 %v1909_v57, %v2853_v53  ;;  %v1527_v19 = vpop.f32.mrb[39].mxu0  ;;  %1921 = vmatpush3.bf16.xpose.msra.mxu1 %v1610_v26  ;;  %v1577_v59 = vmax.f32 %v1533_v55, 0.0 }
 0x417   : > { %v1528_v50 = vadd.f32 %v2853_v53, %v1527_v19  ;;  %1922 = vmatprep.subr.bf16.mxu1 %v2143_v38  ;;  %v1575_v24 = vmax.f32 %v1525_v2, 0.0 }
 0x418   : > { %v1578_v60 = vmax.f32 %v1536_v46, 0.0 }
 0x419   : > { %v1576_v32 = vmax.f32 %v1528_v50, 0.0 }
 0x41a   : > { %v1590_v35 = vpack.c.bf16 %v1578_v60, %v1577_v59 }
 0x41b   : > { %v1589_v21 = vpack.c.bf16 %v1576_v32, %v1575_v24 }
 0x41c   : > { %v1616_v11 = vsel %vm1602_vm3, %v1590_v35, 0 }
 0x41d   : > { %v1613_v9 = vsel %vm1602_vm3, %v1589_v21, 0 }
 0x41e   : > { %1923 = vmatpush3.bf16.xpose.msra.mxu1 %v1613_v9 }
 0x41f   : > { %1924 = vmatprep.subr.bf16.mxu1 %v2143_v38 }
 0x423   : > { %v1912_v23 = vpop.f32.mrb[40].mxu0 }
 0x424   : > { %v1549_v45 = vadd.f32 %v1912_v23, %v2853_v53  ;;  %v1540_v10 = vpop.f32.mrb[41].mxu0 }
 0x425   : > { %v1541_v20 = vadd.f32 %v2853_v53, %v1540_v10  ;;  %v1913_v29 = vpop.f32.mrb[42].mxu0 }
 0x426   : > { %v1552_v54 = vadd.f32 %v1913_v29, %v2853_v53  ;;  %v1543_v58 = vpop.f32.mrb[43].mxu0  ;;  %1925 = vmatpush3.bf16.xpose.msra.mxu1 %v1616_v11  ;;  %v1581_v8 = vmax.f32 %v1549_v45, 0.0 }
 0x427   : > { %v1544_v43 = vadd.f32 %v2853_v53, %v1543_v58  ;;  %1926 = vmatprep.subr.bf16.mxu1 %v2143_v38  ;;  %v1579_v42 = vmax.f32 %v1541_v20, 0.0 }
 0x428   : > { %v1582_v49 = vmax.f32 %v1552_v54, 0.0 }
 0x429   : > { %v1580_v27 = vmax.f32 %v1544_v43, 0.0 }
 0x42a   : > { %v1592_v48 = vpack.c.bf16 %v1582_v49, %v1581_v8 }
 0x42b   : > { %v1591_v17 = vpack.c.bf16 %v1580_v27, %v1579_v42 }
 0x42c   : > { %v1622_v30 = vsel %vm1602_vm3, %v1592_v48, 0 }
 0x42d   : > { %v1619_v39 = vsel %vm1602_vm3, %v1591_v17, 0 }
 0x42e   : > { %1927 = vmatpush3.bf16.xpose.msra.mxu1 %v1619_v39 }
 0x42f   : > { %1928 = vmatprep.subr.bf16.mxu1 %v2143_v38 }
 0x433   : > { %v1916_v37 = vpop.f32.mrb[44].mxu0 }
 0x434   : > { %v1565_v16 = vadd.f32 %v1916_v37, %v2853_v53  ;;  %v1556_v1 = vpop.f32.mrb[45].mxu0 }
 0x435   : > { %v1557_v31 = vadd.f32 %v2853_v53, %v1556_v1  ;;  %v1917_v22 = vpop.f32.mrb[46].mxu0 }
 0x436   : > { %v1568_v63 = vadd.f32 %v1917_v22, %v2853_v53  ;;  %v1559_v0 = vpop.f32.mrb[47].mxu0  ;;  %1929 = vmatpush3.bf16.xpose.msra.mxu1 %v1622_v30  ;;  %v1585_v62 = vmax.f32 %v1565_v16, 0.0 }
 0x437   : > { %v1560_v28 = vadd.f32 %v2853_v53, %v1559_v0  ;;  %1930 = vmatprep.subr.bf16.mxu1 %v2143_v38  ;;  %v1583_v3 = vmax.f32 %v1557_v31, 0.0  ;;  %v1595_v53 = vld [vmem:[%s2944_s7] sm:$0x3] }
 0x438   : > { %v1586_v13 = vmax.f32 %v1568_v63, 0.0 }
 0x439   : > { %v1584_v52 = vmax.f32 %v1560_v28, 0.0 }
 0x43a   : > { %v1594_v40 = vpack.c.bf16 %v1586_v13, %v1585_v62 }
 0x43b   : > { %v1593_v18 = vpack.c.bf16 %v1584_v52, %v1583_v3 }
 0x43c   : > { %v1628_v25 = vsel %vm1602_vm3, %v1594_v40, 0 }
 0x43d   : > { %v1625_v33 = vsel %vm1602_vm3, %v1593_v18, 0 }
 0x43e   : > { %1931 = vmatpush3.bf16.xpose.msra.mxu1 %v1625_v33 }
 0x43f   : > { %1932 = vmatprep.subr.bf16.mxu1 %v2143_v38 }
 0x446   : > { %1933 = vmatpush3.bf16.xpose.msra.mxu1 %v1628_v25 }
 0x44d   : > { %1935 = vmatmul.mubr.msk.bf16.vlgmr.msra.gmra.mrb[32].mxu1 %vm1602_vm3, %v1595_v53 }
 0x520   : > { %v1664_v4 = vpop.f32.mrb[32].mxu1 }
 0x521   : > { %v1936_v7 = vpop.f32.mrb[33].mxu1  ;;  %v1665_v5 = vadd.f32 %v1664_v4, %v1600_v61 }
 0x522   : > { %v1667_v38 = vpop.f32.mrb[34].mxu1 }
 0x523   : > { %1670 = vst [vmem:[%s338_s27] sm:$0x7] %v1665_v5  ;;  %v1937_v34 = vpop.f32.mrb[35].mxu1 }
 0x524   : > { %2091 = shalt.err (!%p2088_p3)
}
 0x525   : > { %s2092_s24 = scalar_lea.hbm %s2895_s16, 64  ;;  %s2096_s27 = scalar_lea.hbm %s2946_s9, 192 }
 0x526   : > { %p2093_p4 = scmp.ne.s32.totalorder %s2895_s16, %s2092_s24  ;;  %p2097_p9 = scmp.lt.u32.totalorder %s2895_s16, %s2946_s9 }
 0x527   : > { %p2098_p10 = scmp.lt.u32.totalorder %s2096_s27, %s2092_s24  ;;  %p2100_p12 = scmp.lt.u32.totalorder %s2092_s24, %s2895_s16 }
 0x528   : > { %p2094_p7 = pnand %p2093_p4, %p2234_p5 }
 0x529   : > { %p2099_p11 = por %p2098_p10, %p2097_p9 }
 0x52a   : > { %p2095_p8 = pneg %p2094_p7 }
 0x52b   : > { %p2101_p13 = por %p2100_p12, %p2099_p11 }
 0x52d   : > { %p2102_p0 = pnand %p2101_p13, %p2095_p8 }
 0x52f   : > { %2105 = shalt.err (!%p2102_p0)
}
 0x530   : > { %1938 = dma.vmem_to_hbm [thread:$0]  (%p2234_p5), %s2897_s28, 64, %s2895_s16, %s1672_s17  }
 0x531 PF: > { %p1944_p1 = scmp.ge.s32.totalorder %s2140_s12, 2  ;;  %s1697_s13 = sand.u32 1, %s2128_s30  }
 0x532   : > { %s1698_s21 = scalar_lea.sflag [#allocation3], %s1697_s13 }
 0x533   : > { %p1941_p2 = pnand %p1944_p1, %p2238_p6 }
 0x535   : > { %2123 = dma.done.wait (!%p1941_p2), %s1698_s21, 64  }
 0x536   : > { %2125 = vsyncadd (!%p1941_p2), %s1698_s21, 4294967232  ;;  %p19_p3 = scmp.ge.s32.totalorder %s2221_s15, 5   ;;  %s2949_s30 = smov %s2132_s10 }
 0x537   : > { %s2950_s10 = smov %s2136_s11  ;;  %s2951_s11 = smov %s2232_s18 }
 0x538   : > { %s2952_s12 = smov %s2221_s15  ;;  %21 = sbr.rel (!%p19_p3) target bundleno = 3 (0x3), region = 91 }
 0x53f   :  { %1703 = vsyncpa [#allocation3], 1 }
 0x540   :  { %1705 = vsyncpa [#allocation3 + $0x1], 1 }

</bundles_post_ra>
